<compile_context>
chip_gen: v6e
topology: v6e:2x2x1
jax: 0.10.0
libtpu: 0.0.40
codegen_flags: <defaults>
</compile_context>

<pallas_src>
import numpy as np
import jax
import jax.numpy as jnp
from jax.experimental import pallas as pl
from jax.experimental.pallas import tpu as pltpu  # used at real sizes (vmem_limit_bytes)

# ---------------- sizes (small, consistent with the module) ----------------
N = 2          # batch
C = 128        # channels (stand-in for densenet121's 1024)
H = W = 8      # feature-map spatial size
HM = WM = 16   # raw mask spatial size (bilinearly resized to (H, W) in the wrapper)
K = 3          # num_classes
BN_EPS = 1e-5


# ---------------- helpers ----------------
def _bilinear_matrix(out_size, in_size):
    """Row-stochastic matrix reproducing F.interpolate(mode='bilinear',
    align_corners=False): half-pixel centers, src clamped at 0, no antialias."""
    A = np.zeros((out_size, in_size), np.float32)
    scale = in_size / out_size
    for i in range(out_size):
        src = max((i + 0.5) * scale - 0.5, 0.0)
        i0 = min(int(np.floor(src)), in_size - 1)
        i1 = min(i0 + 1, in_size - 1)
        l1 = src - i0
        A[i, i0] += 1.0 - l1
        A[i, i1] += l1
    return A


def _leaky_relu(x):
    return jnp.where(x >= 0, x, 0.2 * x)


def _sigmoid_eup(x):
    # exp on EUP + approx reciprocal on EUP: keeps the sigmoid off the VPU.
    # (approx=True is a small systematic bias; well inside the 5e-2 tolerance.)
    return pl.reciprocal(1.0 + jnp.exp(-x), approx=True)


# ---------------- fused Pallas kernel: single step, K classes unrolled ----------------
def _thorax_fused_kernel(fm3_ref, fmT_ref, lmask_b_ref, lmask_row_ref,
                         amask_b_ref, amask_row_ref, bsel_ref,
                         lwfm_ref, lwmfm_ref, lbfm_ref, lbmfm_ref, lwf_ref, lbf_ref,
                         WFM_ref, WMFM_ref, BFM_ref, BMFM_ref, WF_ref, BF_ref,
                         GA_ref, GL_ref,
                         lmap_ref):
    fm3 = fm3_ref[...]                       # (N, HW, C) f32, already ReLU'd
    fmT = fmT_ref[...]                       # (C, N*HW) bf16, transposed feature map
    n, hw, c = fm3.shape
    inv_hw = 1.0 / float(hw)

    # class-independent global pools, cast to bf16 once
    avg_fm = jnp.sum(fm3, axis=1) * inv_hw                              # (N, C)
    max_fm = jnp.max(fm3, axis=1)                                       # (N, C)
    lhs_fm = jnp.concatenate([avg_fm, max_fm], axis=0).astype(jnp.bfloat16)   # (2N, C)

    def channel_weight(mask_b, wfm, wmfm, bfm, bmfm, wf, bf):
        """MaskedAttention up to (and including) the sigmoid channel gate.
        mask_b: (N, HW, C) lane-dense resized mask.  Returns cw: (N, C) f32."""
        mfm3 = fm3 * mask_b                                             # masked fm (VPU)
        max_mfm = jnp.max(mfm3, axis=1)                                 # (N, C)
        avg_mfm = jnp.sum(mfm3, axis=1) * inv_hw                        # (N, C)
        lhs_mfm = jnp.concatenate([max_mfm, avg_mfm], axis=0).astype(jnp.bfloat16)  # (2N,C)
        # two half-width branch matmuls (invariant pools / masked pools); the diagonal
        # blocks are the conv0..conv3 outputs of the original module.
        z_fm = _leaky_relu(jnp.dot(lhs_fm, wfm,
                                   preferred_element_type=jnp.float32) + bfm)   # (2N, 2C)
        z_mfm = _leaky_relu(jnp.dot(lhs_mfm, wmfm,
                                    preferred_element_type=jnp.float32) + bmfm)  # (2N, 2C)
        s = (z_fm[0:n, 0:c] + z_fm[n:2 * n, c:2 * c]
             + z_mfm[0:n, 0:c] + z_mfm[n:2 * n, c:2 * c])               # (N, C)
        # final_block: 1x1 conv -> sigmoid -> dropout (identity in eval)
        return _sigmoid_eup(jnp.dot(s.astype(jnp.bfloat16), wf,
                                    preferred_element_type=jnp.float32) + bf)    # (N, C)

    # lung MaskedAttention channel gate (computed once; the lung attention map itself is
    # never materialized — its contribution is folded into each class' classifier below).
    cwL = channel_weight(lmask_b_ref[...], lwfm_ref[...], lwmfm_ref[...],
                         lbfm_ref[...], lbmfm_ref[...], lwf_ref[...], lbf_ref[...])

    bsel = bsel_ref[...]                     # (N, N*HW) 0/1 batch-column selector
    lmask_row = lmask_row_ref[...]           # (1, N*HW) lung mask, lane-dense row
    num_classes = GA_ref.shape[0]

    for i in range(num_classes):             # Python-unrolled: back-to-back MXU pushes
        cw = channel_weight(amask_b_ref[i], WFM_ref[i], WMFM_ref[i],
                            BFM_ref[i], BMFM_ref[i], WF_ref[i], BF_ref[i])   # (N, C)
        gA = GA_ref[i]                       # (1, C) = wca_i * bns_i      (precomputed)
        gL = GL_ref[i]                       # (1, C) = wcl_i * bns_lung   (precomputed)
        U = gA * cw                          # masked-path fold vector      (N, C)
        V = gA - U                           # unmasked-path fold vector
        UL = gL * cwL
        VL = gL - UL
        S = jnp.concatenate([U, V, UL, VL], axis=0).astype(jnp.bfloat16)     # (4N, C)
        # single per-class MXU matmul against the transposed feature map: no per-class
        # transpose, no attention-map materialization.
        R = jnp.dot(S, fmT, preferred_element_type=jnp.float32)              # (4N, N*HW)
        t = (amask_row_ref[i] * R[0:n] + R[n:2 * n]
             + lmask_row * R[2 * n:3 * n] + R[3 * n:4 * n])                  # (N, N*HW)
        # pick, per column j, the row matching its batch index (bsel is 0/1)
        lmap_ref[i] = jnp.sum(t * bsel, axis=0, keepdims=True)               # (1, N*HW)


# ---------------- wrapper ----------------
def thorax_prior_net_forward(x, abnorm_mask, lung_mask, params):
    """x: backbone feature map, NCHW (N,C,H,W).  abnorm_mask: (N,K,Hm,Wm).
    lung_mask: (N,1,Hm,Wm).  Returns dict like the PyTorch module (eval mode)."""
    # hoisted plumbing: top-level F.relu, layout transposes, bilinear mask resize,
    # mask lane-broadcasts and the classifier-fold constant terms.
    fm = jnp.maximum(x.astype(jnp.float32), 0.0)                       # (N, C, H, W)
    n, c, h, w = fm.shape
    hw = h * w
    fm3 = jnp.transpose(fm, (0, 2, 3, 1)).reshape(n, hw, c)            # (N, HW, C)
    fmT = jnp.transpose(fm, (1, 0, 2, 3)).reshape(c, n * hw).astype(jnp.bfloat16)  # (C, N*HW)

    Ah, Aw = params['Ah'], params['Aw']

    def _resize(m):        # (..., Hm, Wm) -> (..., H, W), align_corners=False
        t = jnp.einsum('...mv,wv->...mw', m, Aw)
        return jnp.einsum('hm,...mw->...hw', Ah, t)

    lmask_hw = _resize(lung_mask[:, 0].astype(jnp.float32)).reshape(n, hw)      # (N, HW)
    am = jnp.transpose(abnorm_mask, (1, 0, 2, 3)).astype(jnp.float32)           # (K,N,Hm,Wm)
    k = am.shape[0]
    amask_hw = _resize(am).reshape(k, n, hw)                                    # (K, N, HW)

    # lane-dense mask forms
    lmask_b = jnp.broadcast_to(lmask_hw[:, :, None], (n, hw, c))                # (N, HW, C)
    amask_b = jnp.broadcast_to(amask_hw[:, :, :, None], (k, n, hw, c))          # (K,N,HW,C)
    lmask_row = lmask_hw.reshape(1, n * hw)                                     # (1, N*HW)
    amask_row = amask_hw.reshape(k, 1, n * hw)                                  # (K,1,N*HW)
    bsel = jnp.kron(jnp.eye(n, dtype=jnp.float32),
                    jnp.ones((1, hw), jnp.float32))                             # (N, N*HW)

    lungp, clsp = params['lung'], params['cls']
    c2 = 2 * c
    # split the 4-branch weights into (unmasked-pool | masked-pool) halves
    lw_fm, lw_mfm = lungp['w4'][:, :c2], lungp['w4'][:, c2:]
    lb_fm, lb_mfm = lungp['b4'][:, :c2], lungp['b4'][:, c2:]
    WFM, WMFM = clsp['W4'][:, :, :c2], clsp['W4'][:, :, c2:]
    BFM, BMFM = clsp['B4'][:, :, :c2], clsp['B4'][:, :, c2:]
    # fold the classifier weights through the eval-mode BatchNorm affine
    GA = clsp['WCA'] * clsp['BNS']                                              # (K, 1, C)
    GL = clsp['WCL'] * lungp['bns'][None]                                       # (K, 1, C)
    consts = (jnp.sum(clsp['WCA'] * clsp['BNB'], axis=(1, 2))
              + jnp.sum(clsp['WCL'] * lungp['bnb'][None], axis=(1, 2))
              + clsp['CB'][:, 0, 0])                                            # (K,)

    # Single fused call, no grid: every input is a whole-array VMEM block (<1 MiB total).
    # At the real C=1024 switch to grid=(K,) with per-class weight BlockSpecs,
    # pipeline_mode=pl.Buffered(1) on constant-index inputs and
    # pltpu.CompilerParams(vmem_limit_bytes=...).
    lmaps_raw = pl.pallas_call(
        _thorax_fused_kernel,
        out_shape=jax.ShapeDtypeStruct((k, 1, n * hw), jnp.float32),
    )(fm3, fmT, lmask_b, lmask_row, amask_b, amask_row, bsel,
      lw_fm, lw_mfm, lb_fm, lb_mfm, lungp['wf'], lungp['bf'],
      WFM, WMFM, BFM, BMFM, clsp['WF'], clsp['BF'], GA, GL)                     # (K,1,N*HW)

    lmaps = (lmaps_raw + consts[:, None, None]).reshape(k, n, h, w)             # (K,N,H,W)
    logit_maps = jnp.transpose(lmaps, (1, 0, 2, 3))                             # (N,K,H,W)
    # pool -> dropout(identity, eval) -> 1x1 conv == spatial mean of the logit map
    logits = jnp.transpose(jnp.mean(lmaps, axis=(2, 3)), (1, 0))                # (N,K)
    return {'logits': logits, 'logit_maps': logit_maps, 'grad_attention_map': None}


# ---------------- deterministic parameter construction ----------------
def make_params(key):
    keys = jax.random.split(key, 2 + K)

    def ma_params(kk):
        ks = jax.random.split(kk, 10)
        std = 1.0 / np.sqrt(C)
        ws = [jax.random.normal(ks[j], (C, C), jnp.float32) * std for j in range(4)]
        wf = jax.random.normal(ks[4], (C, C), jnp.float32) * std
        bs = [jax.random.normal(ks[5 + j], (1, C), jnp.float32) * 0.01 for j in range(4)]
        bf = jax.random.normal(ks[9], (1, C), jnp.float32) * 0.01
        return {
            # weights stored bf16 (autocast-style); biases / BN stay f32
            'w4': jnp.concatenate(ws, axis=1).astype(jnp.bfloat16),      # (C, 4C)
            'b4': jnp.concatenate(bs, axis=1),                           # (1, 4C)
            'wf': wf.astype(jnp.bfloat16),                               # (C, C)
            'bf': bf,                                                    # (1, C)
            # BatchNorm2d defaults: gamma=1, beta=0, running_mean=0, running_var=1
            'bns': jnp.full((1, C), 1.0 / np.sqrt(1.0 + BN_EPS), jnp.float32),
            'bnb': jnp.zeros((1, C), jnp.float32),
        }

    lung = ma_params(keys[0])
    per_class = [ma_params(keys[1 + i]) for i in range(K)]
    cls = {nm.upper(): jnp.stack([p[nm] for p in per_class])
           for nm in ['w4', 'b4', 'wf', 'bf', 'bns', 'bnb']}             # W4,B4,WF,BF,BNS,BNB

    # classifiers[i]: Conv2d(2C -> 1, k=1), xavier_normal weights, split into the
    # (class-attention half, lung-attention half) because of the channel concat.
    kc = jax.random.split(keys[1 + K], 2 * K)
    xn_std = np.sqrt(2.0 / (2 * C + 1))
    wca, wcl, cb = [], [], []
    for i in range(K):
        wfull = jax.random.normal(kc[2 * i], (1, 2 * C), jnp.float32) * xn_std
        wca.append(wfull[:, :C])
        wcl.append(wfull[:, C:])
        cb.append(jax.random.normal(kc[2 * i + 1], (1, 1), jnp.float32) * 0.01)
    cls['WCA'] = jnp.stack(wca)          # (K,1,C)
    cls['WCL'] = jnp.stack(wcl)          # (K,1,C)
    cls['CB'] = jnp.stack(cb)            # (K,1,1)

    return {'Ah': jnp.asarray(_bilinear_matrix(H, HM)),
            'Aw': jnp.asarray(_bilinear_matrix(W, WM)),
            'lung': lung, 'cls': cls}


# ---------------- pure-JAX reference (f32, same parameters) ----------------
def reference_forward(x, abnorm_mask, lung_mask, params):
    fm = jnp.maximum(jnp.transpose(x, (0, 2, 3, 1)).astype(jnp.float32), 0.0)
    Ah, Aw = params['Ah'], params['Aw']

    def resize(m):  # (N,Hm,Wm) -> (N,H,W)
        return jnp.einsum('hm,nmv,wv->nhw', Ah, m, Aw)

    def masked_attention(fm, mask, w4, b4, wf, bf, bns, bnb):
        c = fm.shape[-1]
        mfm = fm * mask[..., None]
        avg_fm = jnp.mean(fm, axis=(1, 2)); max_fm = jnp.max(fm, axis=(1, 2))
        avg_mfm = jnp.mean(mfm, axis=(1, 2)); max_mfm = jnp.max(mfm, axis=(1, 2))
        w4f = w4.astype(jnp.float32)

        def conv_lrelu(v, j):
            y = v @ w4f[:, j * c:(j + 1) * c] + b4[:, j * c:(j + 1) * c]
            return jnp.where(y >= 0, y, 0.2 * y)

        s = (conv_lrelu(avg_fm, 0) + conv_lrelu(max_fm, 1)
             + conv_lrelu(max_mfm, 2) + conv_lrelu(avg_mfm, 3))
        cw = jax.nn.sigmoid(s @ wf.astype(jnp.float32) + bf)
        out = cw[:, None, None, :] * mfm + (1.0 - cw[:, None, None, :]) * fm
        return out * bns + bnb

    lp = params['lung']
    lung_attn = masked_attention(fm, resize(lung_mask[:, 0].astype(jnp.float32)),
                                 lp['w4'], lp['b4'], lp['wf'], lp['bf'],
                                 lp['bns'], lp['bnb'])
    cls = params['cls']
    lmaps, lgs = [], []
    for i in range(abnorm_mask.shape[1]):
        attn = masked_attention(fm, resize(abnorm_mask[:, i].astype(jnp.float32)),
                                cls['W4'][i], cls['B4'][i], cls['WF'][i],
                                cls['BF'][i], cls['BNS'][i], cls['BNB'][i])
        lmap = (jnp.einsum('nhwc,c->nhw', attn, cls['WCA'][i][0])
                + jnp.einsum('nhwc,c->nhw', lung_attn, cls['WCL'][i][0])
                + cls['CB'][i][0, 0])
        lmaps.append(lmap)
        lgs.append(jnp.mean(lmap, axis=(1, 2)))
    return {'logits': jnp.stack(lgs, axis=-1), 'logit_maps': jnp.stack(lmaps, axis=1)}


# ---------------- main ----------------
if __name__ == "__main__":
    key = jax.random.PRNGKey(0)
    k1, k2, k3, k4 = jax.random.split(key, 4)

    # `x` stands in for the DenseNet121 backbone output feature map (NCHW).
    x = jax.random.normal(k1, (N, C, H, W), jnp.float32)
    abnorm_mask = jax.nn.sigmoid(jax.random.normal(k2, (N, K, HM, WM), jnp.float32))
    lung_mask = jax.nn.sigmoid(jax.random.normal(k3, (N, 1, HM, WM), jnp.float32))
    params = make_params(k4)

    fwd = jax.jit(lambda xx, aa, ll: thorax_prior_net_forward(xx, aa, ll, params))
    out = jax.block_until_ready(fwd(x, abnorm_mask, lung_mask))

    ref = reference_forward(x, abnorm_mask, lung_mask, params)
    np.testing.assert_allclose(np.asarray(out['logits']), np.asarray(ref['logits']),
                               rtol=5e-2, atol=5e-2)
    np.testing.assert_allclose(np.asarray(out['logit_maps']), np.asarray(ref['logit_maps']),
                               rtol=5e-2, atol=5e-2)
    assert out['logits'].shape == (N, K)
    assert out['logit_maps'].shape == (N, K, H, W)
    assert out['grad_attention_map'] is None

    print("KERNEL_OK")
</pallas_src>

<mosaic_0001>
module attributes {stable_mosaic.version = 11 : i64} {
  func.func @_thorax_fused_kernel(%arg0: memref<2x64x128xf32, #tpu.memory_space<vmem>>, %arg1: memref<128x128xbf16, #tpu.memory_space<vmem>>, %arg2: memref<2x64x128xf32, #tpu.memory_space<vmem>>, %arg3: memref<1x128xf32, #tpu.memory_space<vmem>>, %arg4: memref<3x2x64x128xf32, #tpu.memory_space<vmem>>, %arg5: memref<3x1x128xf32, #tpu.memory_space<vmem>>, %arg6: memref<2x128xf32, #tpu.memory_space<vmem>>, %arg7: memref<128x256xbf16, #tpu.memory_space<vmem>>, %arg8: memref<128x256xbf16, #tpu.memory_space<vmem>>, %arg9: memref<1x256xf32, #tpu.memory_space<vmem>>, %arg10: memref<1x256xf32, #tpu.memory_space<vmem>>, %arg11: memref<128x128xbf16, #tpu.memory_space<vmem>>, %arg12: memref<1x128xf32, #tpu.memory_space<vmem>>, %arg13: memref<3x128x256xbf16, #tpu.memory_space<vmem>>, %arg14: memref<3x128x256xbf16, #tpu.memory_space<vmem>>, %arg15: memref<3x1x256xf32, #tpu.memory_space<vmem>>, %arg16: memref<3x1x256xf32, #tpu.memory_space<vmem>>, %arg17: memref<3x128x128xbf16, #tpu.memory_space<vmem>>, %arg18: memref<3x1x128xf32, #tpu.memory_space<vmem>>, %arg19: memref<3x1x128xf32, #tpu.memory_space<vmem>>, %arg20: memref<3x1x128xf32, #tpu.memory_space<vmem>>, %arg21: memref<3x1x128xf32, #tpu.memory_space<vmem>>) attributes {dimension_semantics = [], scalar_prefetch = 0 : i64, scratch_operands = 0 : i64, tpu.core_type = #tpu.core_type<tc>} {
    %c0 = arith.constant 0 : index
    %c0_0 = arith.constant 0 : index
    %c0_1 = arith.constant 0 : index
    %0 = vector.load %arg0[%c0, %c0_0, %c0_1] : memref<2x64x128xf32, #tpu.memory_space<vmem>>, vector<2x64x128xf32>
    %c0_2 = arith.constant 0 : index
    %c0_3 = arith.constant 0 : index
    %1 = vector.load %arg1[%c0_2, %c0_3] : memref<128x128xbf16, #tpu.memory_space<vmem>>, vector<128x128xbf16>
    %cst = arith.constant dense<0.000000e+00> : vector<2x128xf32>
    %2 = vector.multi_reduction <add>, %0, %cst [1] : vector<2x64x128xf32> to vector<2x128xf32>
    %cst_4 = arith.constant 1.562500e-02 : f32
    %3 = vector.broadcast %cst_4 : f32 to vector<2x128xf32>
    %4 = arith.mulf %2, %3 : vector<2x128xf32>
    %cst_5 = arith.constant dense<0xFF800000> : vector<2x128xf32>
    %5 = vector.multi_reduction <maximumf>, %0, %cst_5 [1] : vector<2x64x128xf32> to vector<2x128xf32>
    %6 = tpu.concatenate %4, %5 in 0 : vector<2x128xf32>, vector<2x128xf32> -> vector<4x128xf32>
    %7 = arith.truncf %6 : vector<4x128xf32> to vector<4x128xbf16>
    %c0_6 = arith.constant 0 : index
    %c0_7 = arith.constant 0 : index
    %c0_8 = arith.constant 0 : index
    %8 = vector.load %arg2[%c0_6, %c0_7, %c0_8] : memref<2x64x128xf32, #tpu.memory_space<vmem>>, vector<2x64x128xf32>
    %c0_9 = arith.constant 0 : index
    %c0_10 = arith.constant 0 : index
    %9 = vector.load %arg7[%c0_9, %c0_10] : memref<128x256xbf16, #tpu.memory_space<vmem>>, vector<128x256xbf16>
    %c0_11 = arith.constant 0 : index
    %c0_12 = arith.constant 0 : index
    %10 = vector.load %arg8[%c0_11, %c0_12] : memref<128x256xbf16, #tpu.memory_space<vmem>>, vector<128x256xbf16>
    %c0_13 = arith.constant 0 : index
    %c0_14 = arith.constant 0 : index
    %11 = vector.load %arg9[%c0_13, %c0_14] : memref<1x256xf32, #tpu.memory_space<vmem>>, vector<1x256xf32>
    %c0_15 = arith.constant 0 : index
    %c0_16 = arith.constant 0 : index
    %12 = vector.load %arg10[%c0_15, %c0_16] : memref<1x256xf32, #tpu.memory_space<vmem>>, vector<1x256xf32>
    %c0_17 = arith.constant 0 : index
    %c0_18 = arith.constant 0 : index
    %13 = vector.load %arg11[%c0_17, %c0_18] : memref<128x128xbf16, #tpu.memory_space<vmem>>, vector<128x128xbf16>
    %c0_19 = arith.constant 0 : index
    %c0_20 = arith.constant 0 : index
    %14 = vector.load %arg12[%c0_19, %c0_20] : memref<1x128xf32, #tpu.memory_space<vmem>>, vector<1x128xf32>
    %15 = arith.mulf %0, %8 : vector<2x64x128xf32>
    %cst_21 = arith.constant dense<0xFF800000> : vector<2x128xf32>
    %16 = vector.multi_reduction <maximumf>, %15, %cst_21 [1] : vector<2x64x128xf32> to vector<2x128xf32>
    %cst_22 = arith.constant dense<0.000000e+00> : vector<2x128xf32>
    %17 = vector.multi_reduction <add>, %15, %cst_22 [1] : vector<2x64x128xf32> to vector<2x128xf32>
    %cst_23 = arith.constant 1.562500e-02 : f32
    %18 = vector.broadcast %cst_23 : f32 to vector<2x128xf32>
    %19 = arith.mulf %17, %18 : vector<2x128xf32>
    %20 = tpu.concatenate %16, %19 in 0 : vector<2x128xf32>, vector<2x128xf32> -> vector<4x128xf32>
    %21 = arith.truncf %20 : vector<4x128xf32> to vector<4x128xbf16>
    %cst_24 = arith.constant dense<0.000000e+00> : vector<4x256xf32>
    %22 = tpu.matmul %7, %9, %cst_24 {dimension_numbers = #tpu.dot_dimension_numbers<[1], [0], [0], [1], [0, 0, 1, 1], [], []>} : vector<4x128xbf16>, vector<128x256xbf16>, vector<4x256xf32> -> vector<4x256xf32>
    %23 = vector.broadcast %11 : vector<1x256xf32> to vector<4x256xf32>
    %24 = arith.addf %22, %23 : vector<4x256xf32>
    %cst_25 = arith.constant 0.000000e+00 : f32
    %25 = vector.broadcast %cst_25 : f32 to vector<4x256xf32>
    %26 = arith.cmpf oge, %24, %25 : vector<4x256xf32>
    %cst_26 = arith.constant 2.000000e-01 : f32
    %27 = vector.broadcast %cst_26 : f32 to vector<4x256xf32>
    %28 = arith.mulf %27, %24 : vector<4x256xf32>
    %29 = arith.select %26, %24, %28 : vector<4x256xi1>, vector<4x256xf32>
    %cst_27 = arith.constant dense<0.000000e+00> : vector<4x256xf32>
    %30 = tpu.matmul %21, %10, %cst_27 {dimension_numbers = #tpu.dot_dimension_numbers<[1], [0], [0], [1], [0, 0, 1, 1], [], []>} : vector<4x128xbf16>, vector<128x256xbf16>, vector<4x256xf32> -> vector<4x256xf32>
    %31 = vector.broadcast %12 : vector<1x256xf32> to vector<4x256xf32>
    %32 = arith.addf %30, %31 : vector<4x256xf32>
    %cst_28 = arith.constant 0.000000e+00 : f32
    %33 = vector.broadcast %cst_28 : f32 to vector<4x256xf32>
    %34 = arith.cmpf oge, %32, %33 : vector<4x256xf32>
    %cst_29 = arith.constant 2.000000e-01 : f32
    %35 = vector.broadcast %cst_29 : f32 to vector<4x256xf32>
    %36 = arith.mulf %35, %32 : vector<4x256xf32>
    %37 = arith.select %34, %32, %36 : vector<4x256xi1>, vector<4x256xf32>
    %38 = vector.extract_strided_slice %29 {offsets = [0, 0], sizes = [2, 128], strides = [1, 1]} : vector<4x256xf32> to vector<2x128xf32>
    %39 = vector.extract_strided_slice %29 {offsets = [2, 128], sizes = [2, 128], strides = [1, 1]} : vector<4x256xf32> to vector<2x128xf32>
    %40 = arith.addf %38, %39 : vector<2x128xf32>
    %41 = vector.extract_strided_slice %37 {offsets = [0, 0], sizes = [2, 128], strides = [1, 1]} : vector<4x256xf32> to vector<2x128xf32>
    %42 = arith.addf %40, %41 : vector<2x128xf32>
    %43 = vector.extract_strided_slice %37 {offsets = [2, 128], sizes = [2, 128], strides = [1, 1]} : vector<4x256xf32> to vector<2x128xf32>
    %44 = arith.addf %42, %43 : vector<2x128xf32>
    %45 = arith.truncf %44 : vector<2x128xf32> to vector<2x128xbf16>
    %cst_30 = arith.constant dense<0.000000e+00> : vector<2x128xf32>
    %46 = tpu.matmul %45, %13, %cst_30 {dimension_numbers = #tpu.dot_dimension_numbers<[1], [0], [0], [1], [0, 0, 1, 1], [], []>} : vector<2x128xbf16>, vector<128x128xbf16>, vector<2x128xf32> -> vector<2x128xf32>
    %47 = vector.broadcast %14 : vector<1x128xf32> to vector<2x128xf32>
    %48 = arith.addf %46, %47 : vector<2x128xf32>
    %cst_31 = arith.constant 0.000000e+00 : f32
    %49 = vector.broadcast %cst_31 : f32 to vector<2x128xf32>
    %50 = arith.subf %49, %48 : vector<2x128xf32>
    %51 = math.exp %50 : vector<2x128xf32>
    %cst_32 = arith.constant 1.000000e+00 : f32
    %52 = vector.broadcast %cst_32 : f32 to vector<2x128xf32>
    %53 = arith.addf %52, %51 : vector<2x128xf32>
    %54 = tpu.reciprocal %53 {approx = true} : vector<2x128xf32> -> vector<2x128xf32>
    %c0_33 = arith.constant 0 : index
    %c0_34 = arith.constant 0 : index
    %55 = vector.load %arg6[%c0_33, %c0_34] : memref<2x128xf32, #tpu.memory_space<vmem>>, vector<2x128xf32>
    %c0_35 = arith.constant 0 : index
    %c0_36 = arith.constant 0 : index
    %56 = vector.load %arg3[%c0_35, %c0_36] : memref<1x128xf32, #tpu.memory_space<vmem>>, vector<1x128xf32>
    %c0_37 = arith.constant 0 : index
    %c0_38 = arith.constant 0 : index
    %c0_39 = arith.constant 0 : index
    %c0_40 = arith.constant 0 : index
    %57 = vector.load %arg4[%c0_37, %c0_38, %c0_39, %c0_40] : memref<3x2x64x128xf32, #tpu.memory_space<vmem>>, vector<1x2x64x128xf32>
    %58 = vector.shape_cast %57 : vector<1x2x64x128xf32> to vector<2x64x128xf32>
    %c0_41 = arith.constant 0 : index
    %c0_42 = arith.constant 0 : index
    %c0_43 = arith.constant 0 : index
    %59 = vector.load %arg13[%c0_41, %c0_42, %c0_43] : memref<3x128x256xbf16, #tpu.memory_space<vmem>>, vector<1x128x256xbf16>
    %60 = vector.shape_cast %59 : vector<1x128x256xbf16> to vector<128x256xbf16>
    %c0_44 = arith.constant 0 : index
    %c0_45 = arith.constant 0 : index
    %c0_46 = arith.constant 0 : index
    %61 = vector.load %arg14[%c0_44, %c0_45, %c0_46] : memref<3x128x256xbf16, #tpu.memory_space<vmem>>, vector<1x128x256xbf16>
    %62 = vector.shape_cast %61 : vector<1x128x256xbf16> to vector<128x256xbf16>
    %c0_47 = arith.constant 0 : index
    %c0_48 = arith.constant 0 : index
    %c0_49 = arith.constant 0 : index
    %63 = vector.load %arg15[%c0_47, %c0_48, %c0_49] : memref<3x1x256xf32, #tpu.memory_space<vmem>>, vector<1x1x256xf32>
    %64 = vector.shape_cast %63 : vector<1x1x256xf32> to vector<1x256xf32>
    %c0_50 = arith.constant 0 : index
    %c0_51 = arith.constant 0 : index
    %c0_52 = arith.constant 0 : index
    %65 = vector.load %arg16[%c0_50, %c0_51, %c0_52] : memref<3x1x256xf32, #tpu.memory_space<vmem>>, vector<1x1x256xf32>
    %66 = vector.shape_cast %65 : vector<1x1x256xf32> to vector<1x256xf32>
    %c0_53 = arith.constant 0 : index
    %c0_54 = arith.constant 0 : index
    %c0_55 = arith.constant 0 : index
    %67 = vector.load %arg17[%c0_53, %c0_54, %c0_55] : memref<3x128x128xbf16, #tpu.memory_space<vmem>>, vector<1x128x128xbf16>
    %68 = vector.shape_cast %67 : vector<1x128x128xbf16> to vector<128x128xbf16>
    %c0_56 = arith.constant 0 : index
    %c0_57 = arith.constant 0 : index
    %c0_58 = arith.constant 0 : index
    %69 = vector.load %arg18[%c0_56, %c0_57, %c0_58] : memref<3x1x128xf32, #tpu.memory_space<vmem>>, vector<1x1x128xf32>
    %70 = vector.shape_cast %69 : vector<1x1x128xf32> to vector<1x128xf32>
    %71 = arith.mulf %0, %58 : vector<2x64x128xf32>
    %cst_59 = arith.constant dense<0xFF800000> : vector<2x128xf32>
    %72 = vector.multi_reduction <maximumf>, %71, %cst_59 [1] : vector<2x64x128xf32> to vector<2x128xf32>
    %cst_60 = arith.constant dense<0.000000e+00> : vector<2x128xf32>
    %73 = vector.multi_reduction <add>, %71, %cst_60 [1] : vector<2x64x128xf32> to vector<2x128xf32>
    %cst_61 = arith.constant 1.562500e-02 : f32
    %74 = vector.broadcast %cst_61 : f32 to vector<2x128xf32>
    %75 = arith.mulf %73, %74 : vector<2x128xf32>
    %76 = tpu.concatenate %72, %75 in 0 : vector<2x128xf32>, vector<2x128xf32> -> vector<4x128xf32>
    %77 = arith.truncf %76 : vector<4x128xf32> to vector<4x128xbf16>
    %cst_62 = arith.constant dense<0.000000e+00> : vector<4x256xf32>
    %78 = tpu.matmul %7, %60, %cst_62 {dimension_numbers = #tpu.dot_dimension_numbers<[1], [0], [0], [1], [0, 0, 1, 1], [], []>} : vector<4x128xbf16>, vector<128x256xbf16>, vector<4x256xf32> -> vector<4x256xf32>
    %79 = vector.broadcast %64 : vector<1x256xf32> to vector<4x256xf32>
    %80 = arith.addf %78, %79 : vector<4x256xf32>
    %cst_63 = arith.constant 0.000000e+00 : f32
    %81 = vector.broadcast %cst_63 : f32 to vector<4x256xf32>
    %82 = arith.cmpf oge, %80, %81 : vector<4x256xf32>
    %cst_64 = arith.constant 2.000000e-01 : f32
    %83 = vector.broadcast %cst_64 : f32 to vector<4x256xf32>
    %84 = arith.mulf %83, %80 : vector<4x256xf32>
    %85 = arith.select %82, %80, %84 : vector<4x256xi1>, vector<4x256xf32>
    %cst_65 = arith.constant dense<0.000000e+00> : vector<4x256xf32>
    %86 = tpu.matmul %77, %62, %cst_65 {dimension_numbers = #tpu.dot_dimension_numbers<[1], [0], [0], [1], [0, 0, 1, 1], [], []>} : vector<4x128xbf16>, vector<128x256xbf16>, vector<4x256xf32> -> vector<4x256xf32>
    %87 = vector.broadcast %66 : vector<1x256xf32> to vector<4x256xf32>
    %88 = arith.addf %86, %87 : vector<4x256xf32>
    %cst_66 = arith.constant 0.000000e+00 : f32
    %89 = vector.broadcast %cst_66 : f32 to vector<4x256xf32>
    %90 = arith.cmpf oge, %88, %89 : vector<4x256xf32>
    %cst_67 = arith.constant 2.000000e-01 : f32
    %91 = vector.broadcast %cst_67 : f32 to vector<4x256xf32>
    %92 = arith.mulf %91, %88 : vector<4x256xf32>
    %93 = arith.select %90, %88, %92 : vector<4x256xi1>, vector<4x256xf32>
    %94 = vector.extract_strided_slice %85 {offsets = [0, 0], sizes = [2, 128], strides = [1, 1]} : vector<4x256xf32> to vector<2x128xf32>
    %95 = vector.extract_strided_slice %85 {offsets = [2, 128], sizes = [2, 128], strides = [1, 1]} : vector<4x256xf32> to vector<2x128xf32>
    %96 = arith.addf %94, %95 : vector<2x128xf32>
    %97 = vector.extract_strided_slice %93 {offsets = [0, 0], sizes = [2, 128], strides = [1, 1]} : vector<4x256xf32> to vector<2x128xf32>
    %98 = arith.addf %96, %97 : vector<2x128xf32>
    %99 = vector.extract_strided_slice %93 {offsets = [2, 128], sizes = [2, 128], strides = [1, 1]} : vector<4x256xf32> to vector<2x128xf32>
    %100 = arith.addf %98, %99 : vector<2x128xf32>
    %101 = arith.truncf %100 : vector<2x128xf32> to vector<2x128xbf16>
    %cst_68 = arith.constant dense<0.000000e+00> : vector<2x128xf32>
    %102 = tpu.matmul %101, %68, %cst_68 {dimension_numbers = #tpu.dot_dimension_numbers<[1], [0], [0], [1], [0, 0, 1, 1], [], []>} : vector<2x128xbf16>, vector<128x128xbf16>, vector<2x128xf32> -> vector<2x128xf32>
    %103 = vector.broadcast %70 : vector<1x128xf32> to vector<2x128xf32>
    %104 = arith.addf %102, %103 : vector<2x128xf32>
    %cst_69 = arith.constant 0.000000e+00 : f32
    %105 = vector.broadcast %cst_69 : f32 to vector<2x128xf32>
    %106 = arith.subf %105, %104 : vector<2x128xf32>
    %107 = math.exp %106 : vector<2x128xf32>
    %cst_70 = arith.constant 1.000000e+00 : f32
    %108 = vector.broadcast %cst_70 : f32 to vector<2x128xf32>
    %109 = arith.addf %108, %107 : vector<2x128xf32>
    %110 = tpu.reciprocal %109 {approx = true} : vector<2x128xf32> -> vector<2x128xf32>
    %c0_71 = arith.constant 0 : index
    %c0_72 = arith.constant 0 : index
    %c0_73 = arith.constant 0 : index
    %111 = vector.load %arg19[%c0_71, %c0_72, %c0_73] : memref<3x1x128xf32, #tpu.memory_space<vmem>>, vector<1x1x128xf32>
    %112 = vector.shape_cast %111 : vector<1x1x128xf32> to vector<1x128xf32>
    %c0_74 = arith.constant 0 : index
    %c0_75 = arith.constant 0 : index
    %c0_76 = arith.constant 0 : index
    %113 = vector.load %arg20[%c0_74, %c0_75, %c0_76] : memref<3x1x128xf32, #tpu.memory_space<vmem>>, vector<1x1x128xf32>
    %114 = vector.shape_cast %113 : vector<1x1x128xf32> to vector<1x128xf32>
    %115 = vector.broadcast %112 : vector<1x128xf32> to vector<2x128xf32>
    %116 = arith.mulf %115, %110 : vector<2x128xf32>
    %117 = vector.broadcast %112 : vector<1x128xf32> to vector<2x128xf32>
    %118 = arith.subf %117, %116 : vector<2x128xf32>
    %119 = vector.broadcast %114 : vector<1x128xf32> to vector<2x128xf32>
    %120 = arith.mulf %119, %54 : vector<2x128xf32>
    %121 = vector.broadcast %114 : vector<1x128xf32> to vector<2x128xf32>
    %122 = arith.subf %121, %120 : vector<2x128xf32>
    %123 = tpu.concatenate %116, %118, %120, %122 in 0 : vector<2x128xf32>, vector<2x128xf32>, vector<2x128xf32>, vector<2x128xf32> -> vector<8x128xf32>
    %124 = arith.truncf %123 : vector<8x128xf32> to vector<8x128xbf16>
    %cst_77 = arith.constant dense<0.000000e+00> : vector<8x128xf32>
    %125 = tpu.matmul %124, %1, %cst_77 {dimension_numbers = #tpu.dot_dimension_numbers<[1], [0], [0], [1], [0, 0, 1, 1], [], []>} : vector<8x128xbf16>, vector<128x128xbf16>, vector<8x128xf32> -> vector<8x128xf32>
    %c0_78 = arith.constant 0 : index
    %c0_79 = arith.constant 0 : index
    %c0_80 = arith.constant 0 : index
    %126 = vector.load %arg5[%c0_78, %c0_79, %c0_80] : memref<3x1x128xf32, #tpu.memory_space<vmem>>, vector<1x1x128xf32>
    %127 = vector.shape_cast %126 : vector<1x1x128xf32> to vector<1x128xf32>
    %128 = vector.extract_strided_slice %125 {offsets = [0, 0], sizes = [2, 128], strides = [1, 1]} : vector<8x128xf32> to vector<2x128xf32>
    %129 = vector.broadcast %127 : vector<1x128xf32> to vector<2x128xf32>
    %130 = arith.mulf %129, %128 : vector<2x128xf32>
    %131 = vector.extract_strided_slice %125 {offsets = [2, 0], sizes = [2, 128], strides = [1, 1]} : vector<8x128xf32> to vector<2x128xf32>
    %132 = arith.addf %130, %131 : vector<2x128xf32>
    %133 = vector.extract_strided_slice %125 {offsets = [4, 0], sizes = [2, 128], strides = [1, 1]} : vector<8x128xf32> to vector<2x128xf32>
    %134 = vector.broadcast %56 : vector<1x128xf32> to vector<2x128xf32>
    %135 = arith.mulf %134, %133 : vector<2x128xf32>
    %136 = arith.addf %132, %135 : vector<2x128xf32>
    %137 = vector.extract_strided_slice %125 {offsets = [6, 0], sizes = [2, 128], strides = [1, 1]} : vector<8x128xf32> to vector<2x128xf32>
    %138 = arith.addf %136, %137 : vector<2x128xf32>
    %139 = arith.mulf %138, %55 : vector<2x128xf32>
    %cst_81 = arith.constant dense<0.000000e+00> : vector<128xf32>
    %140 = vector.multi_reduction <add>, %139, %cst_81 [0] : vector<2x128xf32> to vector<128xf32>
    %141 = vector.shape_cast %140 : vector<128xf32> to vector<1x128xf32>
    %c0_82 = arith.constant 0 : index
    %c0_83 = arith.constant 0 : index
    %c0_84 = arith.constant 0 : index
    %142 = vector.load %arg21[%c0_82, %c0_83, %c0_84] : memref<3x1x128xf32, #tpu.memory_space<vmem>>, vector<1x1x128xf32>
    %143 = vector.shape_cast %142 : vector<1x1x128xf32> to vector<1x128xf32>
    %144 = vector.shape_cast %141 : vector<1x128xf32> to vector<1x1x128xf32>
    tpu.vector_store %arg21[%c0_82, %c0_83, %c0_84], %144 {strides = array<i32>} : memref<3x1x128xf32, #tpu.memory_space<vmem>>, vector<1x1x128xf32>,
    %c1 = arith.constant 1 : index
    %c0_85 = arith.constant 0 : index
    %c0_86 = arith.constant 0 : index
    %c0_87 = arith.constant 0 : index
    %145 = vector.load %arg4[%c1, %c0_85, %c0_86, %c0_87] : memref<3x2x64x128xf32, #tpu.memory_space<vmem>>, vector<1x2x64x128xf32>
    %146 = vector.shape_cast %145 : vector<1x2x64x128xf32> to vector<2x64x128xf32>
    %c1_88 = arith.constant 1 : index
    %c0_89 = arith.constant 0 : index
    %c0_90 = arith.constant 0 : index
    %147 = vector.load %arg13[%c1_88, %c0_89, %c0_90] : memref<3x128x256xbf16, #tpu.memory_space<vmem>>, vector<1x128x256xbf16>
    %148 = vector.shape_cast %147 : vector<1x128x256xbf16> to vector<128x256xbf16>
    %c1_91 = arith.constant 1 : index
    %c0_92 = arith.constant 0 : index
    %c0_93 = arith.constant 0 : index
    %149 = vector.load %arg14[%c1_91, %c0_92, %c0_93] : memref<3x128x256xbf16, #tpu.memory_space<vmem>>, vector<1x128x256xbf16>
    %150 = vector.shape_cast %149 : vector<1x128x256xbf16> to vector<128x256xbf16>
    %c1_94 = arith.constant 1 : index
    %c0_95 = arith.constant 0 : index
    %c0_96 = arith.constant 0 : index
    %151 = vector.load %arg15[%c1_94, %c0_95, %c0_96] : memref<3x1x256xf32, #tpu.memory_space<vmem>>, vector<1x1x256xf32>
    %152 = vector.shape_cast %151 : vector<1x1x256xf32> to vector<1x256xf32>
    %c1_97 = arith.constant 1 : index
    %c0_98 = arith.constant 0 : index
    %c0_99 = arith.constant 0 : index
    %153 = vector.load %arg16[%c1_97, %c0_98, %c0_99] : memref<3x1x256xf32, #tpu.memory_space<vmem>>, vector<1x1x256xf32>
    %154 = vector.shape_cast %153 : vector<1x1x256xf32> to vector<1x256xf32>
    %c1_100 = arith.constant 1 : index
    %c0_101 = arith.constant 0 : index
    %c0_102 = arith.constant 0 : index
    %155 = vector.load %arg17[%c1_100, %c0_101, %c0_102] : memref<3x128x128xbf16, #tpu.memory_space<vmem>>, vector<1x128x128xbf16>
    %156 = vector.shape_cast %155 : vector<1x128x128xbf16> to vector<128x128xbf16>
    %c1_103 = arith.constant 1 : index
    %c0_104 = arith.constant 0 : index
    %c0_105 = arith.constant 0 : index
    %157 = vector.load %arg18[%c1_103, %c0_104, %c0_105] : memref<3x1x128xf32, #tpu.memory_space<vmem>>, vector<1x1x128xf32>
    %158 = vector.shape_cast %157 : vector<1x1x128xf32> to vector<1x128xf32>
    %159 = arith.mulf %0, %146 : vector<2x64x128xf32>
    %cst_106 = arith.constant dense<0xFF800000> : vector<2x128xf32>
    %160 = vector.multi_reduction <maximumf>, %159, %cst_106 [1] : vector<2x64x128xf32> to vector<2x128xf32>
    %cst_107 = arith.constant dense<0.000000e+00> : vector<2x128xf32>
    %161 = vector.multi_reduction <add>, %159, %cst_107 [1] : vector<2x64x128xf32> to vector<2x128xf32>
    %cst_108 = arith.constant 1.562500e-02 : f32
    %162 = vector.broadcast %cst_108 : f32 to vector<2x128xf32>
    %163 = arith.mulf %161, %162 : vector<2x128xf32>
    %164 = tpu.concatenate %160, %163 in 0 : vector<2x128xf32>, vector<2x128xf32> -> vector<4x128xf32>
    %165 = arith.truncf %164 : vector<4x128xf32> to vector<4x128xbf16>
    %cst_109 = arith.constant dense<0.000000e+00> : vector<4x256xf32>
    %166 = tpu.matmul %7, %148, %cst_109 {dimension_numbers = #tpu.dot_dimension_numbers<[1], [0], [0], [1], [0, 0, 1, 1], [], []>} : vector<4x128xbf16>, vector<128x256xbf16>, vector<4x256xf32> -> vector<4x256xf32>
    %167 = vector.broadcast %152 : vector<1x256xf32> to vector<4x256xf32>
    %168 = arith.addf %166, %167 : vector<4x256xf32>
    %cst_110 = arith.constant 0.000000e+00 : f32
    %169 = vector.broadcast %cst_110 : f32 to vector<4x256xf32>
    %170 = arith.cmpf oge, %168, %169 : vector<4x256xf32>
    %cst_111 = arith.constant 2.000000e-01 : f32
    %171 = vector.broadcast %cst_111 : f32 to vector<4x256xf32>
    %172 = arith.mulf %171, %168 : vector<4x256xf32>
    %173 = arith.select %170, %168, %172 : vector<4x256xi1>, vector<4x256xf32>
    %cst_112 = arith.constant dense<0.000000e+00> : vector<4x256xf32>
    %174 = tpu.matmul %165, %150, %cst_112 {dimension_numbers = #tpu.dot_dimension_numbers<[1], [0], [0], [1], [0, 0, 1, 1], [], []>} : vector<4x128xbf16>, vector<128x256xbf16>, vector<4x256xf32> -> vector<4x256xf32>
    %175 = vector.broadcast %154 : vector<1x256xf32> to vector<4x256xf32>
    %176 = arith.addf %174, %175 : vector<4x256xf32>
    %cst_113 = arith.constant 0.000000e+00 : f32
    %177 = vector.broadcast %cst_113 : f32 to vector<4x256xf32>
    %178 = arith.cmpf oge, %176, %177 : vector<4x256xf32>
    %cst_114 = arith.constant 2.000000e-01 : f32
    %179 = vector.broadcast %cst_114 : f32 to vector<4x256xf32>
    %180 = arith.mulf %179, %176 : vector<4x256xf32>
    %181 = arith.select %178, %176, %180 : vector<4x256xi1>, vector<4x256xf32>
    %182 = vector.extract_strided_slice %173 {offsets = [0, 0], sizes = [2, 128], strides = [1, 1]} : vector<4x256xf32> to vector<2x128xf32>
    %183 = vector.extract_strided_slice %173 {offsets = [2, 128], sizes = [2, 128], strides = [1, 1]} : vector<4x256xf32> to vector<2x128xf32>
    %184 = arith.addf %182, %183 : vector<2x128xf32>
    %185 = vector.extract_strided_slice %181 {offsets = [0, 0], sizes = [2, 128], strides = [1, 1]} : vector<4x256xf32> to vector<2x128xf32>
    %186 = arith.addf %184, %185 : vector<2x128xf32>
    %187 = vector.extract_strided_slice %181 {offsets = [2, 128], sizes = [2, 128], strides = [1, 1]} : vector<4x256xf32> to vector<2x128xf32>
    %188 = arith.addf %186, %187 : vector<2x128xf32>
    %189 = arith.truncf %188 : vector<2x128xf32> to vector<2x128xbf16>
    %cst_115 = arith.constant dense<0.000000e+00> : vector<2x128xf32>
    %190 = tpu.matmul %189, %156, %cst_115 {dimension_numbers = #tpu.dot_dimension_numbers<[1], [0], [0], [1], [0, 0, 1, 1], [], []>} : vector<2x128xbf16>, vector<128x128xbf16>, vector<2x128xf32> -> vector<2x128xf32>
    %191 = vector.broadcast %158 : vector<1x128xf32> to vector<2x128xf32>
    %192 = arith.addf %190, %191 : vector<2x128xf32>
    %cst_116 = arith.constant 0.000000e+00 : f32
    %193 = vector.broadcast %cst_116 : f32 to vector<2x128xf32>
    %194 = arith.subf %193, %192 : vector<2x128xf32>
    %195 = math.exp %194 : vector<2x128xf32>
    %cst_117 = arith.constant 1.000000e+00 : f32
    %196 = vector.broadcast %cst_117 : f32 to vector<2x128xf32>
    %197 = arith.addf %196, %195 : vector<2x128xf32>
    %198 = tpu.reciprocal %197 {approx = true} : vector<2x128xf32> -> vector<2x128xf32>
    %c1_118 = arith.constant 1 : index
    %c0_119 = arith.constant 0 : index
    %c0_120 = arith.constant 0 : index
    %199 = vector.load %arg19[%c1_118, %c0_119, %c0_120] : memref<3x1x128xf32, #tpu.memory_space<vmem>>, vector<1x1x128xf32>
    %200 = vector.shape_cast %199 : vector<1x1x128xf32> to vector<1x128xf32>
    %c1_121 = arith.constant 1 : index
    %c0_122 = arith.constant 0 : index
    %c0_123 = arith.constant 0 : index
    %201 = vector.load %arg20[%c1_121, %c0_122, %c0_123] : memref<3x1x128xf32, #tpu.memory_space<vmem>>, vector<1x1x128xf32>
    %202 = vector.shape_cast %201 : vector<1x1x128xf32> to vector<1x128xf32>
    %203 = vector.broadcast %200 : vector<1x128xf32> to vector<2x128xf32>
    %204 = arith.mulf %203, %198 : vector<2x128xf32>
    %205 = vector.broadcast %200 : vector<1x128xf32> to vector<2x128xf32>
    %206 = arith.subf %205, %204 : vector<2x128xf32>
    %207 = vector.broadcast %202 : vector<1x128xf32> to vector<2x128xf32>
    %208 = arith.mulf %207, %54 : vector<2x128xf32>
    %209 = vector.broadcast %202 : vector<1x128xf32> to vector<2x128xf32>
    %210 = arith.subf %209, %208 : vector<2x128xf32>
    %211 = tpu.concatenate %204, %206, %208, %210 in 0 : vector<2x128xf32>, vector<2x128xf32>, vector<2x128xf32>, vector<2x128xf32> -> vector<8x128xf32>
    %212 = arith.truncf %211 : vector<8x128xf32> to vector<8x128xbf16>
    %cst_124 = arith.constant dense<0.000000e+00> : vector<8x128xf32>
    %213 = tpu.matmul %212, %1, %cst_124 {dimension_numbers = #tpu.dot_dimension_numbers<[1], [0], [0], [1], [0, 0, 1, 1], [], []>} : vector<8x128xbf16>, vector<128x128xbf16>, vector<8x128xf32> -> vector<8x128xf32>
    %c1_125 = arith.constant 1 : index
    %c0_126 = arith.constant 0 : index
    %c0_127 = arith.constant 0 : index
    %214 = vector.load %arg5[%c1_125, %c0_126, %c0_127] : memref<3x1x128xf32, #tpu.memory_space<vmem>>, vector<1x1x128xf32>
    %215 = vector.shape_cast %214 : vector<1x1x128xf32> to vector<1x128xf32>
    %216 = vector.extract_strided_slice %213 {offsets = [0, 0], sizes = [2, 128], strides = [1, 1]} : vector<8x128xf32> to vector<2x128xf32>
    %217 = vector.broadcast %215 : vector<1x128xf32> to vector<2x128xf32>
    %218 = arith.mulf %217, %216 : vector<2x128xf32>
    %219 = vector.extract_strided_slice %213 {offsets = [2, 0], sizes = [2, 128], strides = [1, 1]} : vector<8x128xf32> to vector<2x128xf32>
    %220 = arith.addf %218, %219 : vector<2x128xf32>
    %221 = vector.extract_strided_slice %213 {offsets = [4, 0], sizes = [2, 128], strides = [1, 1]} : vector<8x128xf32> to vector<2x128xf32>
    %222 = vector.broadcast %56 : vector<1x128xf32> to vector<2x128xf32>
    %223 = arith.mulf %222, %221 : vector<2x128xf32>
    %224 = arith.addf %220, %223 : vector<2x128xf32>
    %225 = vector.extract_strided_slice %213 {offsets = [6, 0], sizes = [2, 128], strides = [1, 1]} : vector<8x128xf32> to vector<2x128xf32>
    %226 = arith.addf %224, %225 : vector<2x128xf32>
    %227 = arith.mulf %226, %55 : vector<2x128xf32>
    %cst_128 = arith.constant dense<0.000000e+00> : vector<128xf32>
    %228 = vector.multi_reduction <add>, %227, %cst_128 [0] : vector<2x128xf32> to vector<128xf32>
    %229 = vector.shape_cast %228 : vector<128xf32> to vector<1x128xf32>
    %c1_129 = arith.constant 1 : index
    %c0_130 = arith.constant 0 : index
    %c0_131 = arith.constant 0 : index
    %230 = vector.load %arg21[%c1_129, %c0_130, %c0_131] : memref<3x1x128xf32, #tpu.memory_space<vmem>>, vector<1x1x128xf32>
    %231 = vector.shape_cast %230 : vector<1x1x128xf32> to vector<1x128xf32>
    %232 = vector.shape_cast %229 : vector<1x128xf32> to vector<1x1x128xf32>
    tpu.vector_store %arg21[%c1_129, %c0_130, %c0_131], %232 {strides = array<i32>} : memref<3x1x128xf32, #tpu.memory_space<vmem>>, vector<1x1x128xf32>,
    %c2 = arith.constant 2 : index
    %c0_132 = arith.constant 0 : index
    %c0_133 = arith.constant 0 : index
    %c0_134 = arith.constant 0 : index
    %233 = vector.load %arg4[%c2, %c0_132, %c0_133, %c0_134] : memref<3x2x64x128xf32, #tpu.memory_space<vmem>>, vector<1x2x64x128xf32>
    %234 = vector.shape_cast %233 : vector<1x2x64x128xf32> to vector<2x64x128xf32>
    %c2_135 = arith.constant 2 : index
    %c0_136 = arith.constant 0 : index
    %c0_137 = arith.constant 0 : index
    %235 = vector.load %arg13[%c2_135, %c0_136, %c0_137] : memref<3x128x256xbf16, #tpu.memory_space<vmem>>, vector<1x128x256xbf16>
    %236 = vector.shape_cast %235 : vector<1x128x256xbf16> to vector<128x256xbf16>
    %c2_138 = arith.constant 2 : index
    %c0_139 = arith.constant 0 : index
    %c0_140 = arith.constant 0 : index
    %237 = vector.load %arg14[%c2_138, %c0_139, %c0_140] : memref<3x128x256xbf16, #tpu.memory_space<vmem>>, vector<1x128x256xbf16>
    %238 = vector.shape_cast %237 : vector<1x128x256xbf16> to vector<128x256xbf16>
    %c2_141 = arith.constant 2 : index
    %c0_142 = arith.constant 0 : index
    %c0_143 = arith.constant 0 : index
    %239 = vector.load %arg15[%c2_141, %c0_142, %c0_143] : memref<3x1x256xf32, #tpu.memory_space<vmem>>, vector<1x1x256xf32>
    %240 = vector.shape_cast %239 : vector<1x1x256xf32> to vector<1x256xf32>
    %c2_144 = arith.constant 2 : index
    %c0_145 = arith.constant 0 : index
    %c0_146 = arith.constant 0 : index
    %241 = vector.load %arg16[%c2_144, %c0_145, %c0_146] : memref<3x1x256xf32, #tpu.memory_space<vmem>>, vector<1x1x256xf32>
    %242 = vector.shape_cast %241 : vector<1x1x256xf32> to vector<1x256xf32>
    %c2_147 = arith.constant 2 : index
    %c0_148 = arith.constant 0 : index
    %c0_149 = arith.constant 0 : index
    %243 = vector.load %arg17[%c2_147, %c0_148, %c0_149] : memref<3x128x128xbf16, #tpu.memory_space<vmem>>, vector<1x128x128xbf16>
    %244 = vector.shape_cast %243 : vector<1x128x128xbf16> to vector<128x128xbf16>
    %c2_150 = arith.constant 2 : index
    %c0_151 = arith.constant 0 : index
    %c0_152 = arith.constant 0 : index
    %245 = vector.load %arg18[%c2_150, %c0_151, %c0_152] : memref<3x1x128xf32, #tpu.memory_space<vmem>>, vector<1x1x128xf32>
    %246 = vector.shape_cast %245 : vector<1x1x128xf32> to vector<1x128xf32>
    %247 = arith.mulf %0, %234 : vector<2x64x128xf32>
    %cst_153 = arith.constant dense<0xFF800000> : vector<2x128xf32>
    %248 = vector.multi_reduction <maximumf>, %247, %cst_153 [1] : vector<2x64x128xf32> to vector<2x128xf32>
    %cst_154 = arith.constant dense<0.000000e+00> : vector<2x128xf32>
    %249 = vector.multi_reduction <add>, %247, %cst_154 [1] : vector<2x64x128xf32> to vector<2x128xf32>
    %cst_155 = arith.constant 1.562500e-02 : f32
    %250 = vector.broadcast %cst_155 : f32 to vector<2x128xf32>
    %251 = arith.mulf %249, %250 : vector<2x128xf32>
    %252 = tpu.concatenate %248, %251 in 0 : vector<2x128xf32>, vector<2x128xf32> -> vector<4x128xf32>
    %253 = arith.truncf %252 : vector<4x128xf32> to vector<4x128xbf16>
    %cst_156 = arith.constant dense<0.000000e+00> : vector<4x256xf32>
    %254 = tpu.matmul %7, %236, %cst_156 {dimension_numbers = #tpu.dot_dimension_numbers<[1], [0], [0], [1], [0, 0, 1, 1], [], []>} : vector<4x128xbf16>, vector<128x256xbf16>, vector<4x256xf32> -> vector<4x256xf32>
    %255 = vector.broadcast %240 : vector<1x256xf32> to vector<4x256xf32>
    %256 = arith.addf %254, %255 : vector<4x256xf32>
    %cst_157 = arith.constant 0.000000e+00 : f32
    %257 = vector.broadcast %cst_157 : f32 to vector<4x256xf32>
    %258 = arith.cmpf oge, %256, %257 : vector<4x256xf32>
    %cst_158 = arith.constant 2.000000e-01 : f32
    %259 = vector.broadcast %cst_158 : f32 to vector<4x256xf32>
    %260 = arith.mulf %259, %256 : vector<4x256xf32>
    %261 = arith.select %258, %256, %260 : vector<4x256xi1>, vector<4x256xf32>
    %cst_159 = arith.constant dense<0.000000e+00> : vector<4x256xf32>
    %262 = tpu.matmul %253, %238, %cst_159 {dimension_numbers = #tpu.dot_dimension_numbers<[1], [0], [0], [1], [0, 0, 1, 1], [], []>} : vector<4x128xbf16>, vector<128x256xbf16>, vector<4x256xf32> -> vector<4x256xf32>
    %263 = vector.broadcast %242 : vector<1x256xf32> to vector<4x256xf32>
    %264 = arith.addf %262, %263 : vector<4x256xf32>
    %cst_160 = arith.constant 0.000000e+00 : f32
    %265 = vector.broadcast %cst_160 : f32 to vector<4x256xf32>
    %266 = arith.cmpf oge, %264, %265 : vector<4x256xf32>
    %cst_161 = arith.constant 2.000000e-01 : f32
    %267 = vector.broadcast %cst_161 : f32 to vector<4x256xf32>
    %268 = arith.mulf %267, %264 : vector<4x256xf32>
    %269 = arith.select %266, %264, %268 : vector<4x256xi1>, vector<4x256xf32>
    %270 = vector.extract_strided_slice %261 {offsets = [0, 0], sizes = [2, 128], strides = [1, 1]} : vector<4x256xf32> to vector<2x128xf32>
    %271 = vector.extract_strided_slice %261 {offsets = [2, 128], sizes = [2, 128], strides = [1, 1]} : vector<4x256xf32> to vector<2x128xf32>
    %272 = arith.addf %270, %271 : vector<2x128xf32>
    %273 = vector.extract_strided_slice %269 {offsets = [0, 0], sizes = [2, 128], strides = [1, 1]} : vector<4x256xf32> to vector<2x128xf32>
    %274 = arith.addf %272, %273 : vector<2x128xf32>
    %275 = vector.extract_strided_slice %269 {offsets = [2, 128], sizes = [2, 128], strides = [1, 1]} : vector<4x256xf32> to vector<2x128xf32>
    %276 = arith.addf %274, %275 : vector<2x128xf32>
    %277 = arith.truncf %276 : vector<2x128xf32> to vector<2x128xbf16>
    %cst_162 = arith.constant dense<0.000000e+00> : vector<2x128xf32>
    %278 = tpu.matmul %277, %244, %cst_162 {dimension_numbers = #tpu.dot_dimension_numbers<[1], [0], [0], [1], [0, 0, 1, 1], [], []>} : vector<2x128xbf16>, vector<128x128xbf16>, vector<2x128xf32> -> vector<2x128xf32>
    %279 = vector.broadcast %246 : vector<1x128xf32> to vector<2x128xf32>
    %280 = arith.addf %278, %279 : vector<2x128xf32>
    %cst_163 = arith.constant 0.000000e+00 : f32
    %281 = vector.broadcast %cst_163 : f32 to vector<2x128xf32>
    %282 = arith.subf %281, %280 : vector<2x128xf32>
    %283 = math.exp %282 : vector<2x128xf32>
    %cst_164 = arith.constant 1.000000e+00 : f32
    %284 = vector.broadcast %cst_164 : f32 to vector<2x128xf32>
    %285 = arith.addf %284, %283 : vector<2x128xf32>
    %286 = tpu.reciprocal %285 {approx = true} : vector<2x128xf32> -> vector<2x128xf32>
    %c2_165 = arith.constant 2 : index
    %c0_166 = arith.constant 0 : index
    %c0_167 = arith.constant 0 : index
    %287 = vector.load %arg19[%c2_165, %c0_166, %c0_167] : memref<3x1x128xf32, #tpu.memory_space<vmem>>, vector<1x1x128xf32>
    %288 = vector.shape_cast %287 : vector<1x1x128xf32> to vector<1x128xf32>
    %c2_168 = arith.constant 2 : index
    %c0_169 = arith.constant 0 : index
    %c0_170 = arith.constant 0 : index
    %289 = vector.load %arg20[%c2_168, %c0_169, %c0_170] : memref<3x1x128xf32, #tpu.memory_space<vmem>>, vector<1x1x128xf32>
    %290 = vector.shape_cast %289 : vector<1x1x128xf32> to vector<1x128xf32>
    %291 = vector.broadcast %288 : vector<1x128xf32> to vector<2x128xf32>
    %292 = arith.mulf %291, %286 : vector<2x128xf32>
    %293 = vector.broadcast %288 : vector<1x128xf32> to vector<2x128xf32>
    %294 = arith.subf %293, %292 : vector<2x128xf32>
    %295 = vector.broadcast %290 : vector<1x128xf32> to vector<2x128xf32>
    %296 = arith.mulf %295, %54 : vector<2x128xf32>
    %297 = vector.broadcast %290 : vector<1x128xf32> to vector<2x128xf32>
    %298 = arith.subf %297, %296 : vector<2x128xf32>
    %299 = tpu.concatenate %292, %294, %296, %298 in 0 : vector<2x128xf32>, vector<2x128xf32>, vector<2x128xf32>, vector<2x128xf32> -> vector<8x128xf32>
    %300 = arith.truncf %299 : vector<8x128xf32> to vector<8x128xbf16>
    %cst_171 = arith.constant dense<0.000000e+00> : vector<8x128xf32>
    %301 = tpu.matmul %300, %1, %cst_171 {dimension_numbers = #tpu.dot_dimension_numbers<[1], [0], [0], [1], [0, 0, 1, 1], [], []>} : vector<8x128xbf16>, vector<128x128xbf16>, vector<8x128xf32> -> vector<8x128xf32>
    %c2_172 = arith.constant 2 : index
    %c0_173 = arith.constant 0 : index
    %c0_174 = arith.constant 0 : index
    %302 = vector.load %arg5[%c2_172, %c0_173, %c0_174] : memref<3x1x128xf32, #tpu.memory_space<vmem>>, vector<1x1x128xf32>
    %303 = vector.shape_cast %302 : vector<1x1x128xf32> to vector<1x128xf32>
    %304 = vector.extract_strided_slice %301 {offsets = [0, 0], sizes = [2, 128], strides = [1, 1]} : vector<8x128xf32> to vector<2x128xf32>
    %305 = vector.broadcast %303 : vector<1x128xf32> to vector<2x128xf32>
    %306 = arith.mulf %305, %304 : vector<2x128xf32>
    %307 = vector.extract_strided_slice %301 {offsets = [2, 0], sizes = [2, 128], strides = [1, 1]} : vector<8x128xf32> to vector<2x128xf32>
    %308 = arith.addf %306, %307 : vector<2x128xf32>
    %309 = vector.extract_strided_slice %301 {offsets = [4, 0], sizes = [2, 128], strides = [1, 1]} : vector<8x128xf32> to vector<2x128xf32>
    %310 = vector.broadcast %56 : vector<1x128xf32> to vector<2x128xf32>
    %311 = arith.mulf %310, %309 : vector<2x128xf32>
    %312 = arith.addf %308, %311 : vector<2x128xf32>
    %313 = vector.extract_strided_slice %301 {offsets = [6, 0], sizes = [2, 128], strides = [1, 1]} : vector<8x128xf32> to vector<2x128xf32>
    %314 = arith.addf %312, %313 : vector<2x128xf32>
    %315 = arith.mulf %314, %55 : vector<2x128xf32>
    %cst_175 = arith.constant dense<0.000000e+00> : vector<128xf32>
    %316 = vector.multi_reduction <add>, %315, %cst_175 [0] : vector<2x128xf32> to vector<128xf32>
    %317 = vector.shape_cast %316 : vector<128xf32> to vector<1x128xf32>
    %c2_176 = arith.constant 2 : index
    %c0_177 = arith.constant 0 : index
    %c0_178 = arith.constant 0 : index
    %318 = vector.load %arg21[%c2_176, %c0_177, %c0_178] : memref<3x1x128xf32, #tpu.memory_space<vmem>>, vector<1x1x128xf32>
    %319 = vector.shape_cast %318 : vector<1x1x128xf32> to vector<1x128xf32>
    %320 = vector.shape_cast %317 : vector<1x128xf32> to vector<1x1x128xf32>
    tpu.vector_store %arg21[%c2_176, %c0_177, %c0_178], %320 {strides = array<i32>} : memref<3x1x128xf32, #tpu.memory_space<vmem>>, vector<1x1x128xf32>,
    return
  }
}

</mosaic_0001>

<bundles_post_ra>
// kernel: _lambda_.1
= control target key start
LH: loop header
LB: loop body
LE: loop exit
PB: predicated region body
PF: predicated region fallthrough
CT: control target
= control target key end

     0   :  { %v4910_v1 = vmov 0   ;;  %vm162_vm0 = vcmask 1043459   ;;  %vm157_vm1 = vcmask 1041409   ;;  %vm165_vm2 = vcmask 1041408   ;;  %s4880_s7 = inlined_call_operand.vmem [shape: bf16[128,256], index: 7, kind: input, shape index: {}]   ;;  %s4881_s8 = inlined_call_operand.vmem [shape: bf16[128,256], index: 8, kind: input, shape index: {}]   ;;  %s4882_s0 = inlined_call_operand.vmem [shape: f32[2,64,128], index: 0, kind: input, shape index: {}]   ;;  %s4883_s2 = inlined_call_operand.vmem [shape: f32[2,64,128], index: 2, kind: input, shape index: {}]   ;;  %s4884_s11 = inlined_call_operand.vmem [shape: bf16[128,128], index: 11, kind: input, shape index: {}]   ;;  %s4885_s13 = inlined_call_operand.vmem [shape: bf16[3,128,256], index: 13, kind: input, shape index: {}]   ;;  %s4886_s14 = inlined_call_operand.vmem [shape: bf16[3,128,256], index: 14, kind: input, shape index: {}]   ;;  %s4887_s4 = inlined_call_operand.vmem [shape: f32[3,2,64,128], index: 4, kind: input, shape index: {}]   ;;  %s4888_s9 = inlined_call_operand.vmem [shape: f32[1,256], index: 9, kind: input, shape index: {}]   ;;  %s4889_s10 = inlined_call_operand.vmem [shape: f32[1,256], index: 10, kind: input, shape index: {}]   ;;  %s4890_s17 = inlined_call_operand.vmem [shape: bf16[3,128,128], index: 17, kind: input, shape index: {}]   ;;  %s4891_s15 = inlined_call_operand.vmem [shape: f32[3,1,256], index: 15, kind: input, shape index: {}]   ;;  %s4892_s12 = inlined_call_operand.vmem [shape: f32[1,128], index: 12, kind: input, shape index: {}]   ;;  %s4893_s16 = inlined_call_operand.vmem [shape: f32[3,1,256], index: 16, kind: input, shape index: {}]   ;;  %s4894_s20 = inlined_call_operand.vmem [shape: f32[3,1,128], index: 20, kind: input, shape index: {}]   ;;  %s4895_s1 = inlined_call_operand.vmem [shape: bf16[128,128], index: 1, kind: input, shape index: {}]   ;;  %s4896_s18 = inlined_call_operand.vmem [shape: f32[3,1,128], index: 18, kind: input, shape index: {}]   ;;  %s4897_s19 = inlined_call_operand.vmem [shape: f32[3,1,128], index: 19, kind: input, shape index: {}]   ;;  %s4898_s3 = inlined_call_operand.vmem [shape: f32[1,128], index: 3, kind: input, shape index: {}]   ;;  %s4899_s5 = inlined_call_operand.vmem [shape: f32[3,1,128], index: 5, kind: input, shape index: {}]   ;;  %s4900_s6 = inlined_call_operand.vmem [shape: f32[2,128], index: 6, kind: input, shape index: {}]   ;;  %s4901_s21 = inlined_call_operand.vmem [shape: f32[3,1,128], index: 21, kind: output, shape index: {}]  }
   0x1   :  { %4912 = sst [smem:[#allocation2_spill]] %s4880_s7  ;;  %438 = vmatprep.mubr.bf16.mxu0 %v4910_v1  ;;  %576 = vmatprep.mubr.bf16.mxu1 %v4910_v1  ;;  %vm3477_vm3 = vmmov 0   ;;  %vm1262_vm12 = vcmask 1043456   ;;  %vm1264_vm13 = vcmask 1045504  }
   0x2   :  { %4913 = sst [smem:[#allocation3_spill]] %s4881_s8 }
   0x3   :  { %4914 = sst [smem:[#allocation4_spill]] %s4882_s0 }
   0x4   :  { %4915 = sst [smem:[#allocation5_spill]] %s4883_s2 }
   0x5   :  { %4916 = sst [smem:[#allocation6_spill]] %s4884_s11 }
   0x6   :  { %4917 = sst [smem:[#allocation7_spill]] %s4885_s13 }
   0x7   :  { %s4918_s26 = sld [smem:[#allocation2_spill]] }
   0x8   :  { %s4919_s28 = sld [smem:[#allocation3_spill]] }
   0x9   :  { %s4920_s27 = sld [smem:[#allocation4_spill]] }
   0xa   :  { %s4921_s25 = sld [smem:[#allocation5_spill]] }
   0xb   :  { %s4922_s29 = sld [smem:[#allocation6_spill]] }
   0xc   :  { %s4923_s2 = sld [smem:[#allocation7_spill]] }
   0xd   :  { %v3210_v0 = vld [vmem:[%s4918_s26 + $0x74] ss:$8 sps:$4 sm:$0xff]   ;;  %v3214_v3 = vld [vmem:[%s4918_s26 + $0x70] ss:$8 sps:$4 sm:$0xff]   ;;  %v3216_v5 = vld [vmem:[%s4918_s26 + $0x64] ss:$8 sps:$4 sm:$0xff]  }
   0xe   :  { %v3212_v2 = vld [vmem:[%s4919_s28 + $0x74] ss:$8 sps:$4 sm:$0xff]   ;;  %406 = vmatprep.subr.bf16.mxu0 %v3210_v0  ;;  %v3215_v4 = vld [vmem:[%s4919_s28 + $0x70] ss:$8 sps:$4 sm:$0xff]   ;;  %v3218_v6 = vld [vmem:[%s4919_s28 + $0x64] ss:$8 sps:$4 sm:$0xff]  }
   0xf   :  { %544 = vmatprep.subr.bf16.mxu1 %v3212_v2  ;;  %407 = vmatpush1.bf16.msra.mxu0 %v3214_v3  ;;  %v3220_v7 = vld [vmem:[%s4918_s26 + $0x60] ss:$8 sps:$4 sm:$0xff]   ;;  %v3222_v9 = vld [vmem:[%s4918_s26 + $0x54] ss:$8 sps:$4 sm:$0xff]   ;;  %v3226_v11 = vld [vmem:[%s4918_s26 + $0x50] ss:$8 sps:$4 sm:$0xff]  }
  0x10   :  { %545 = vmatpush1.bf16.msra.mxu1 %v3215_v4  ;;  %408 = vmatprep.subr.bf16.mxu0 %v3216_v5  ;;  %v3221_v8 = vld [vmem:[%s4919_s28 + $0x60] ss:$8 sps:$4 sm:$0xff]   ;;  %v3224_v10 = vld [vmem:[%s4919_s28 + $0x54] ss:$8 sps:$4 sm:$0xff]   ;;  %v3227_v12 = vld [vmem:[%s4919_s28 + $0x50] ss:$8 sps:$4 sm:$0xff]  }
  0x11   :  { %546 = vmatprep.subr.bf16.mxu1 %v3218_v6  ;;  %v3228_v13 = vld [vmem:[%s4918_s26 + $0x44] ss:$8 sps:$4 sm:$0xff]   ;;  %v3232_v15 = vld [vmem:[%s4918_s26 + $0x40] ss:$8 sps:$4 sm:$0xff]   ;;  %v3234_v17 = vld [vmem:[%s4918_s26 + $0x34] ss:$8 sps:$4 sm:$0xff]  }
  0x12   :  { %v3230_v14 = vld [vmem:[%s4919_s28 + $0x44] ss:$8 sps:$4 sm:$0xff]   ;;  %v3233_v16 = vld [vmem:[%s4919_s28 + $0x40] ss:$8 sps:$4 sm:$0xff]   ;;  %v3236_v18 = vld [vmem:[%s4919_s28 + $0x34] ss:$8 sps:$4 sm:$0xff]  }
  0x13   :  { %409 = vmatpush1.bf16.msra.mxu0 %v3220_v7  ;;  %v3238_v19 = vld [vmem:[%s4918_s26 + $0x30] ss:$8 sps:$4 sm:$0xff]   ;;  %v3240_v21 = vld [vmem:[%s4918_s26 + $0x24] ss:$8 sps:$4 sm:$0xff]   ;;  %v3244_v23 = vld [vmem:[%s4918_s26 + $0x20] ss:$8 sps:$4 sm:$0xff]  }
  0x14   :  { %547 = vmatpush1.bf16.msra.mxu1 %v3221_v8  ;;  %410 = vmatprep.subr.bf16.mxu0 %v3222_v9  ;;  %v3239_v20 = vld [vmem:[%s4919_s28 + $0x30] ss:$8 sps:$4 sm:$0xff]   ;;  %v3242_v22 = vld [vmem:[%s4919_s28 + $0x24] ss:$8 sps:$4 sm:$0xff]   ;;  %v3245_v24 = vld [vmem:[%s4919_s28 + $0x20] ss:$8 sps:$4 sm:$0xff]  }
  0x15   :  { %548 = vmatprep.subr.bf16.mxu1 %v3224_v10  ;;  %v3246_v25 = vld [vmem:[%s4918_s26 + $0x14] ss:$8 sps:$4 sm:$0xff]   ;;  %v3671_v27 = vld [vmem:[%s4920_s27] sm:$0xff]  ;;  %v3676_v28 = vld [vmem:[%s4920_s27 + $0x8] sm:$0xff] }
  0x16   :  { %v3248_v26 = vld [vmem:[%s4919_s28 + $0x14] ss:$8 sps:$4 sm:$0xff]   ;;  %v3250_v29 = vld [vmem:[%s4918_s26 + $0x10] ss:$8 sps:$4 sm:$0xff]   ;;  %v101_v33 = vadd.f32 %v3676_v28, %v3671_v27  ;;  %v3699_v34 = vld [vmem:[%s4920_s27 + $0x20] sm:$0xff] }
  0x17   :  { %411 = vmatpush1.bf16.msra.mxu0 %v3226_v11  ;;  %v3251_v30 = vld [vmem:[%s4919_s28 + $0x10] ss:$8 sps:$4 sm:$0xff]   ;;  %v3704_v35 = vld [vmem:[%s4920_s27 + $0x28] sm:$0xff]  ;;  %v3718_v39 = vld [vmem:[%s4920_s27 + $0x40] sm:$0xff] }
  0x18   :  { %549 = vmatpush1.bf16.msra.mxu1 %v3227_v12  ;;  %412 = vmatprep.subr.bf16.mxu0 %v3228_v13  ;;  %v3687_v31 = vld [vmem:[%s4920_s27 + $0x10] sm:$0xff]  ;;  %v3692_v32 = vld [vmem:[%s4920_s27 + $0x18] sm:$0xff]  ;;  %v3723_v40 = vld [vmem:[%s4920_s27 + $0x48] sm:$0xff] }
  0x19   :  { %550 = vmatprep.subr.bf16.mxu1 %v3230_v14  ;;  %v3709_v36 = vld [vmem:[%s4920_s27 + $0x38] sm:$0xff]  ;;  %v129_v37 = vmax.f32 %v3671_v27, %v3687_v31  ;;  %v130_v38 = vmax.f32 %v3676_v28, %v3692_v32  ;;  %v3728_v41 = vld [vmem:[%s4920_s27 + $0x50] sm:$0xff]  ;;  %v102_v42 = vadd.f32 %v101_v33, %v3687_v31  ;;  %v3252_v43 = vld [vmem:[%s4918_s26 + $0x4] ss:$8 sps:$4 sm:$0xff]   ;;  %v114_v46 = vadd.f32 %v3723_v40, %v3718_v39 }
  0x1a   :  { %v3254_v44 = vld [vmem:[%s4919_s28 + $0x4] ss:$8 sps:$4 sm:$0xff]   ;;  %v3740_v45 = vld [vmem:[%s4920_s27 + $0x58] sm:$0xff]  ;;  %v3256_v49 = vld [vmem:[%s4918_s26] ss:$8 sps:$4 sm:$0xff]   ;;  %v142_v53 = vmax.f32 %v3718_v39, %v3728_v41 }
  0x1b   :  { %413 = vmatpush1.bf16.msra.mxu0 %v3232_v15  ;;  %v131_v47 = vmax.f32 %v129_v37, %v3699_v34  ;;  %v132_v48 = vmax.f32 %v130_v38, %v3704_v35  ;;  %v3752_v50 = vld [vmem:[%s4920_s27 + $0x30] sm:$0xff]  ;;  %v3757_v51 = vld [vmem:[%s4920_s27 + $0x60] sm:$0xff]  ;;  %v103_v52 = vadd.f32 %v102_v42, %v3692_v32  ;;  %v143_v54 = vmax.f32 %v3723_v40, %v3740_v45  ;;  %v3770_v56 = vld [vmem:[%s4920_s27 + $0x68] sm:$0xff] }
  0x1c   :  { %551 = vmatpush1.bf16.msra.mxu1 %v3233_v16  ;;  %414 = vmatprep.subr.bf16.mxu0 %v3234_v17  ;;  %v168_v55 = vld [vmem:[%s4921_s25] sm:$0xff]  ;;  %v3775_v57 = vld [vmem:[%s4920_s27 + $0x78] sm:$0xff]  ;;  %v115_v58 = vadd.f32 %v114_v46, %v3728_v41  ;;  %v169_v61 = vld [vmem:[%s4921_s25 + $0x8] sm:$0xff]  ;;  %v144_v0 = vmax.f32 %v142_v53, %v3757_v51 }
  0x1d   :  { %552 = vmatprep.subr.bf16.mxu1 %v3236_v18  ;;  %v133_v59 = vmax.f32 %v131_v47, %v3752_v50  ;;  %v134_v60 = vmax.f32 %v132_v48, %v3709_v36  ;;  %v3257_v62 = vld [vmem:[%s4919_s28] ss:$8 sps:$4 sm:$0xff]   ;;  %v104_v63 = vadd.f32 %v103_v52, %v3699_v34  ;;  %v145_v2 = vmax.f32 %v143_v54, %v3770_v56  ;;  %v170_v3 = vld [vmem:[%s4921_s25 + $0x10] sm:$0xff]  ;;  %v171_v4 = vld [vmem:[%s4921_s25 + $0x18] sm:$0xff] }
  0x1e   :  { %v3798_v5 = vld [vmem:[%s4920_s27 + $0x70] sm:$0xff]  ;;  %v116_v6 = vadd.f32 %v115_v58, %v3740_v45  ;;  %v172_v8 = vld [vmem:[%s4921_s25 + $0x20] sm:$0xff]  ;;  %v173_v9 = vld [vmem:[%s4921_s25 + $0x28] sm:$0xff]  ;;  %v3808_v10 = vmul.f32 %v168_v55, %v3671_v27  ;;  %v3823_v17 = vmul.f32 %v169_v61, %v3676_v28 }
  0x1f   :  { %415 = vmatpush1.bf16.msra.mxu0 %v3238_v19  ;;  %v135_v7 = vmax.f32 %v133_v59, %v134_v60  ;;  %v105_v11 = vadd.f32 %v104_v63, %v3704_v35  ;;  %v146_v12 = vmax.f32 %v144_v0, %v3798_v5  ;;  %v147_v13 = vmax.f32 %v145_v2, %v3775_v57  ;;  %v174_v14 = vld [vmem:[%s4921_s25 + $0x30] sm:$0xff]  ;;  %v175_v15 = vld [vmem:[%s4921_s25 + $0x38] sm:$0xff]  ;;  %v176_v16 = vld [vmem:[%s4921_s25 + $0x40] sm:$0xff] }
  0x20   :  { %553 = vmatpush1.bf16.msra.mxu1 %v3239_v20  ;;  %416 = vmatprep.subr.bf16.mxu0 %v3240_v21  ;;  %v117_v18 = vadd.f32 %v116_v6, %v3757_v51  ;;  %v177_v20 = vld [vmem:[%s4921_s25 + $0x48] sm:$0xff]  ;;  %v178_v21 = vld [vmem:[%s4921_s25 + $0x50] sm:$0xff]  ;;  %v3853_v42 = vmul.f32 %v173_v9, %v3704_v35  ;;  %v243_v52 = vmul.f32 %v176_v16, %v3718_v39  ;;  %v183_v61 = vld [vmem:[%s4921_s25 + $0x78] sm:$0xff] }
  0x21   :  { %554 = vmatprep.subr.bf16.mxu1 %v3242_v22  ;;  %v136_v19 = vrot.slane %v135_v7, 4  ;;  %v179_v22 = vld [vmem:[%s4921_s25 + $0x58] sm:$0xff]  ;;  %v181_v38 = vld [vmem:[%s4921_s25 + $0x68] sm:$0xff]  ;;  %v182_v48 = vld [vmem:[%s4921_s25 + $0x70] sm:$0xff]  ;;  %v244_v55 = vmul.f32 %v177_v20, %v3723_v40  ;;  %v245_v58 = vmul.f32 %v178_v21, %v3728_v41 }
  0x22   :  { %v118_v33 = vadd.f32 %v117_v18, %v3770_v56 }
  0x23   :  { %417 = vmatpush1.bf16.msra.mxu0 %v3244_v23  ;;  %v3836_v23 = vmul.f32 %v170_v3, %v3687_v31  ;;  %v137_v37 = vmax.f32 %v135_v7, %v136_v19  ;;  %v248_v3 = vmul.f32 %v181_v38, %v3770_v56 }
  0x24   :  { %555 = vmatpush1.bf16.msra.mxu1 %v3245_v24  ;;  %418 = vmatprep.subr.bf16.mxu0 %v3246_v25  ;;  %v3839_v24 = vmul.f32 %v171_v4, %v3692_v32  ;;  %v106_v25 = vadd.f32 %v105_v11, %v3752_v50  ;;  %v119_v53 = vadd.f32 %v118_v33, %v3798_v5 }
  0x25   :  { %556 = vmatprep.subr.bf16.mxu1 %v3248_v26  ;;  %v148_v26 = vmax.f32 %v146_v12, %v147_v13  ;;  %v138_v54 = vrot.slane %v137_v37, 2  ;;  %v249_v4 = vmul.f32 %v182_v48, %v3798_v5  ;;  %v250_v12 = vmul.f32 %v183_v61, %v3775_v57 }
  0x26   :  { %v107_v46 = vadd.f32 %v106_v25, %v3709_v36  ;;  %v120_v0 = vadd.f32 %v119_v53, %v3775_v57  ;;  %v252_v9 = vmax.f32 %v3823_v17, %v3839_v24  ;;  %v264_v13 = vmax.f32 %v243_v52, %v245_v58 }
  0x27   :  { %419 = vmatpush1.bf16.msra.mxu0 %v3250_v29  ;;  %v180_v29 = vld [vmem:[%s4921_s25 + $0x60] sm:$0xff]  ;;  %v149_v47 = vrot.slane %v148_v26, 4  ;;  %v139_v2 = vmax.f32 %v137_v37, %v138_v54  ;;  %v277_v48 = vadd.f32 %v3823_v17, %v3808_v10 }
  0x28   :  { %557 = vmatpush1.bf16.msra.mxu1 %v3251_v30  ;;  %420 = vmatprep.subr.bf16.mxu0 %v3252_v43  ;;  %v3846_v30 = vmul.f32 %v172_v8, %v3699_v34  ;;  %v3856_v43 = vmul.f32 %v174_v14, %v3752_v50  ;;  %v108_v59 = vrot.slane %v107_v46, 4  ;;  %v247_v63 = vmul.f32 %v180_v29, %v3757_v51 }
  0x29   :  { %558 = vmatprep.subr.bf16.mxu1 %v3254_v44  ;;  %v4908_v44 = vmov 0.0   ;;  %v150_v60 = vmax.f32 %v148_v26, %v149_v47  ;;  %v251_v8 = vmax.f32 %v3808_v10, %v3836_v23  ;;  %v121_v11 = vrot.slane %v120_v0, 4 }
  0x2a   :  { %v109_v6 = vadd.f32 %v108_v59, %v107_v46  ;;  %v254_v19 = vmax.f32 %v252_v9, %v3853_v42  ;;  %v140_v21 = vrot.slane %v139_v2, 1  ;;  %v290_v59 = vadd.f32 %v244_v55, %v243_v52 }
  0x2b   :  { %421 = vmatpush1.bf16.msra.mxu0 %v3256_v49  ;;  %v3864_v49 = vmul.f32 %v175_v15, %v3709_v36  ;;  %v151_v7 = vrot.slane %v150_v60, 2  ;;  %v253_v18 = vmax.f32 %v251_v8, %v3846_v30  ;;  %v122_v20 = vadd.f32 %v121_v11, %v120_v0 }
  0x2c   :  { %559 = vmatpush1.bf16.msra.mxu1 %v3257_v62  ;;  %3067 = vmatprep.subr.bf16.mxu0 %v4908_v44  ;;  %v246_v62 = vmul.f32 %v179_v22, %v3740_v45  ;;  %v110_v15 = vrot.slane %v109_v6, 2  ;;  %v266_v22 = vmax.f32 %v264_v13, %v247_v63  ;;  %v278_v0 = vadd.f32 %v277_v48, %v3836_v23 }
  0x2d   :  { %v152_v16 = vmax.f32 %v150_v60, %v151_v7  ;;  %v255_v33 = vmax.f32 %v253_v18, %v3856_v43  ;;  %v256_v37 = vmax.f32 %v254_v19, %v3864_v49  ;;  %v123_v38 = vrot.slane %v122_v20, 2 }
  0x2e   :  { %v265_v14 = vmax.f32 %v244_v55, %v246_v62  ;;  %v111_v26 = vadd.f32 %v110_v15, %v109_v6  ;;  %v268_v46 = vmax.f32 %v266_v22, %v249_v4  ;;  %v141_v6 = vmax.f32 %v139_v2, %v140_v21 }
  0x2f   :  { %v153_v29 = vrot.slane %v152_v16, 1  ;;  %v257_v54 = vmax.f32 %v255_v33, %v256_v37  ;;  %v124_v60 = vadd.f32 %v123_v38, %v122_v20  ;;  %v291_v9 = vadd.f32 %v290_v59, %v245_v58 }
  0x30   :  { %v267_v25 = vmax.f32 %v265_v14, %v248_v3  ;;  %v112_v53 = vrot.slane %v111_v26, 1  ;;  %v279_v15 = vadd.f32 %v278_v0, %v3839_v24 }
  0x31   :  { %v258_v8 = vrot.slane %v257_v54, 4  ;;  %v125_v11 = vrot.slane %v124_v60, 1  ;;  %v154_v13 = vmax.f32 %v152_v16, %v153_v29  ;;  %v292_v18 = vadd.f32 %v291_v9, %v246_v62 }
  0x32   :  { %v269_v47 = vmax.f32 %v267_v25, %v250_v12  ;;  %v113_v7 = vadd.f32 %v112_v53, %v111_v26  ;;  %v280_v17 = vadd.f32 %v279_v15, %v3846_v30 }
  0x33   :  { %v126_v19 = vadd.f32 %v125_v11, %v124_v60  ;;  %v259_v52 = vmax.f32 %v257_v54, %v258_v8  ;;  %v293_v20 = vadd.f32 %v292_v18, %v247_v63  ;;  %v163_v2 = vsel %vm162_vm0, %v154_v13, %v141_v6  ;;  %v3258_v63 = vld [vmem:[%s4922_s29 + $0x38] sm:$0xff]   ;;  %v3261_v6 = vld [vmem:[%s4922_s29 + $0x20] sm:$0xff]  }
  0x34   :  { %v270_v61 = vmax.f32 %v268_v46, %v269_v47  ;;  %v127_v10 = vmul.f32 0.015625, %v113_v7  ;;  %v281_v58 = vadd.f32 %v280_v17, %v3853_v42  ;;  %v3263_v17 = vld [vmem:[%s4922_s29 + $0x10] sm:$0xff]  }
  0x35   :  { %v128_v23 = vmul.f32 0.015625, %v126_v19  ;;  %v294_v16 = vadd.f32 %v293_v20, %v248_v3  ;;  %v260_v22 = vrot.slane %v259_v52, 2  ;;  %v3267_v20 = vld [vmem:[%s4922_s29 + $0x8] sm:$0xff]  }
  0x36   :  { %v271_v14 = vrot.slane %v270_v61, 4  ;;  %v282_v24 = vadd.f32 %v281_v58, %v3856_v43  ;;  %v3271_v58 = vld [vmem:[%s4922_s29] sm:$0xff]  }
  0x37   :  { %v158_v21 = vsel %vm157_vm1, %v128_v23, %v127_v10  ;;  %v295_v30 = vadd.f32 %v294_v16, %v249_v4  ;;  %v261_v3 = vmax.f32 %v259_v52, %v260_v22  ;;  %v3259_v4 = vld [vmem:[%s4922_s29 + $0x30] sm:$0xff]   ;;  %v3262_v10 = vld [vmem:[%s4922_s29 + $0x18] sm:$0xff]   ;;  %v3270_v23 = vld [vmem:[%s4923_s2 + $0x64] ss:$8 sps:$4 sm:$0xff]  }
  0x38   :  { %v272_v55 = vmax.f32 %v270_v61, %v271_v14  ;;  %v166_v62 = vsel %vm165_vm2, %v158_v21, %v163_v2  ;;  %v283_v29 = vadd.f32 %v282_v24, %v3864_v49  ;;  %v3266_v52 = vld [vmem:[%s4923_s2 + $0x74] ss:$8 sps:$4 sm:$0xff]   ;;  %v3268_v2 = vld [vmem:[%s4923_s2 + $0x60] ss:$8 sps:$4 sm:$0xff]   ;;  %v3272_v21 = vld [vmem:[%s4923_s2 + $0x50] ss:$8 sps:$4 sm:$0xff]  }
  0x39   :  { %v3900_v26 = vpack.c.bf16 %v166_v62, %v166_v62  ;;  %v296_v33 = vadd.f32 %v295_v30, %v250_v12  ;;  %v262_v48 = vrot.slane %v261_v3, 1  ;;  %v3260_v12 = vld [vmem:[%s4922_s29 + $0x28] sm:$0xff]   ;;  %940 = vmatprep.subr.bf16.mxu1 %v3266_v52  ;;  %v3274_v16 = vld [vmem:[%s4923_s2 + $0x54] ss:$8 sps:$4 sm:$0xff]  }
  0x3a   :  { %v273_v25 = vrot.slane %v272_v55, 2  ;;  %v284_v42 = vrot.slane %v283_v29, 4  ;;  %v3277_v24 = vld [vmem:[%s4886_s14 + $0x74] ss:$8 sps:$4 sm:$0xff]   ;;  %v3278_v62 = vld [vmem:[%s4923_s2 + $0x40] ss:$8 sps:$4 sm:$0xff]  }
  0x3b   :  { %439 = vmatmul.mubr.bf16.vlgmr.msra.gmra.mxu0 %v3900_v26  ;;  %v297_v43 = vrot.slane %v296_v33, 4  ;;  %v263_v61 = vmax.f32 %v261_v3, %v262_v48  ;;  %v3280_v22 = vld [vmem:[%s4923_s2 + $0x44] ss:$8 sps:$4 sm:$0xff]   ;;  %v3286_v30 = vld [vmem:[%s4923_s2 + $0x34] ss:$8 sps:$4 sm:$0xff]  }
  0x3c   :  { %v274_v37 = vmax.f32 %v272_v55, %v273_v25  ;;  %3068 = vmatpush3.bf16.msra.mxu0 %v3258_v63  ;;  %v285_v38 = vadd.f32 %v284_v42, %v283_v29  ;;  %v3264_v55 = vld [vmem:[%s4923_s2 + $0x70] ss:$8 sps:$4 sm:$0xff]   ;;  %3083 = vmatprep.mubr.msk.bf16.mxu0 %vm3477_vm3, %v4908_v44  ;;  %v3290_v63 = vld [vmem:[%s4923_s2 + $0x20] ss:$8 sps:$4 sm:$0xff]   ;;  %v3292_v29 = vld [vmem:[%s4923_s2 + $0x24] ss:$8 sps:$4 sm:$0xff]  }
  0x3d   :  { %3069 = vmatprep.subr.bf16.mxu0 %v4908_v44  ;;  %v298_v46 = vadd.f32 %v297_v43, %v296_v33  ;;  %v3284_v25 = vld [vmem:[%s4923_s2 + $0x30] ss:$8 sps:$4 sm:$0xff]   ;;  %v3298_v42 = vld [vmem:[%s4923_s2 + $0x14] ss:$8 sps:$4 sm:$0xff]   ;;  %v3302_v3 = vld [vmem:[%s4923_s2] ss:$8 sps:$4 sm:$0xff]  }
  0x3e   :  { %v286_v47 = vrot.slane %v285_v38, 2  ;;  %v275_v53 = vrot.slane %v274_v37, 1  ;;  %v3296_v33 = vld [vmem:[%s4923_s2 + $0x10] ss:$8 sps:$4 sm:$0xff]   ;;  %v702_v43 = vld [vmem:[%s4887_s4] sm:$0xff] }
  0x3f   :  { %v299_v49 = vrot.slane %v298_v46, 2  ;;  %v4006_v48 = vmul.f32 %v702_v43, %v3671_v27 }
  0x40   :  { %3070 = vmatpush3.bf16.msra.mxu0 %v3259_v4  ;;  %v287_v54 = vadd.f32 %v286_v47, %v285_v38  ;;  %v276_v0 = vmax.f32 %v274_v37, %v275_v53  ;;  %v3304_v37 = vld [vmem:[%s4923_s2 + $0x4] ss:$8 sps:$4 sm:$0xff]   ;;  %v316_v4 = vlaneseq }
  0x41   :  { %3071 = vmatprep.subr.bf16.mxu0 %v4908_v44  ;;  %v300_v59 = vadd.f32 %v299_v49, %v298_v46  ;;  %v703_v38 = vld [vmem:[%s4887_s4 + $0x8] sm:$0xff]  ;;  %v710_v46 = vld [vmem:[%s4887_s4 + $0x40] sm:$0xff] }
  0x42   :  { %v288_v60 = vrot.slane %v287_v54, 1  ;;  %v307_v14 = vsel %vm157_vm1, %v276_v0, %v263_v61  ;;  %v711_v47 = vld [vmem:[%s4887_s4 + $0x48] sm:$0xff]  ;;  %v4009_v53 = vmul.f32 %v703_v38, %v3676_v28  ;;  %v4012_v49 = vmul.f32 %v710_v46, %v3718_v39 }
  0x43   :  { %v301_v7 = vrot.slane %v300_v59, 1 }
  0x44   :  { %3072 = vmatpush3.bf16.msra.mxu0 %v3260_v12  ;;  %v289_v8 = vadd.f32 %v288_v60, %v287_v54  ;;  %v4015_v12 = vmul.f32 %v711_v47, %v3723_v40  ;;  %v317_v54 = vshrl.u32 %v316_v4, 7  ;;  %v712_v60 = vld [vmem:[%s4887_s4 + $0x50] sm:$0xff]  ;;  %v811_v39 = vadd.f32 %v4009_v53, %v4006_v48 }
  0x45   :  { %3073 = vmatprep.subr.bf16.mxu0 %v4908_v44  ;;  %v302_v9 = vadd.f32 %v301_v7, %v300_v59  ;;  %v704_v59 = vld [vmem:[%s4887_s4 + $0x10] sm:$0xff]  ;;  %v779_v61 = vmul.f32 %v712_v60, %v3728_v41  ;;  %v705_v7 = vld [vmem:[%s4887_s4 + $0x18] sm:$0xff] }
  0x46   :  { %v303_v11 = vmul.f32 0.015625, %v289_v8  ;;  %v4023_v27 = vsub.s32 1, %v317_v54  ;;  %v771_v28 = vmul.f32 %v704_v59, %v3687_v31  ;;  %v824_v40 = vadd.f32 %v4015_v12, %v4012_v49  ;;  %v216_v31 = vld [vmem:[%s4888_s9] sm:$0x3] }
  0x47   :  { %v304_v13 = vmul.f32 0.015625, %v302_v9  ;;  %v772_v9 = vmul.f32 %v705_v7, %v3692_v32  ;;  %v707_v32 = vld [vmem:[%s4887_s4 + $0x28] sm:$0xff] }
  0x48   :  { %3074 = vmatpush3.bf16.msra.mxu0 %v3261_v6  ;;  %v713_v6 = vld [vmem:[%s4887_s4 + $0x58] sm:$0xff]  ;;  %v323_v41 = vrot.slane %v216_v31, %v4023_v27 }
  0x49   :  { %3075 = vmatprep.subr.bf16.mxu0 %v4908_v44  ;;  %v311_v15 = vsel %vm162_vm0, %v304_v13, %v303_v11  ;;  %v780_v11 = vmul.f32 %v713_v6, %v3740_v45  ;;  %v812_v13 = vadd.f32 %v811_v39, %v771_v28 }
  0x4a   :  { %v313_v18 = vsel %vm165_vm2, %v307_v14, %v311_v15  ;;  %v825_v14 = vadd.f32 %v824_v40, %v779_v61  ;;  %v4043_v15 = vsub.s32 0, %v317_v54 }
  0x4b   :  { %v314_v19 = vpack.c.bf16 %v313_v18, %v313_v18  ;;  %v799_v43 = vmax.f32 %v4015_v12, %v780_v11 }
  0x4c   :  { %3076 = vmatpush3.bf16.msra.mxu0 %v3262_v10  ;;  %v714_v10 = vld [vmem:[%s4887_s4 + $0x60] sm:$0xff] }
  0x4d   :  { %577 = vmatmul.mubr.bf16.vlgmr.msra.gmra.mxu1 %v314_v19  ;;  %3077 = vmatprep.subr.bf16.mxu0 %v4908_v44  ;;  %v706_v19 = vld [vmem:[%s4887_s4 + $0x20] sm:$0xff] }
  0x4e   :  { %972 = vmatprep.mubr.bf16.mxu1 %v4910_v1  ;;  %941 = vmatpush1.bf16.msra.mxu1 %v3264_v55  ;;  %v773_v45 = vmul.f32 %v706_v19, %v3699_v34  ;;  %v781_v55 = vmul.f32 %v714_v10, %v3757_v51  ;;  %v716_v34 = vld [vmem:[%s4887_s4 + $0x70] sm:$0xff] }
  0x4f   :  { %942 = vmatprep.subr.bf16.mxu1 %v3270_v23  ;;  %v826_v23 = vadd.f32 %v825_v14, %v780_v11 }
  0x50   :  { %3078 = vmatpush3.bf16.msra.mxu0 %v3263_v17 }
  0x51   :  { %3079 = vmatprep.subr.bf16.mxu0 %v4908_v44 }
  0x52   :  { %943 = vmatpush1.bf16.msra.mxu1 %v3268_v2  ;;  %v319_v2 = vrot.slane %v216_v31, %v4043_v15 }
  0x53   :  { %944 = vmatprep.subr.bf16.mxu1 %v3274_v16 }
  0x54   :  { %3080 = vmatpush3.bf16.msra.mxu0 %v3267_v20  ;;  %v813_v20 = vadd.f32 %v812_v13, %v772_v9 }
  0x55   :  { %3081 = vmatprep.subr.bf16.mxu0 %v4908_v44 }
  0x56   :  { %945 = vmatpush1.bf16.msra.mxu1 %v3272_v21  ;;  %v774_v21 = vmul.f32 %v707_v32, %v3704_v35  ;;  %v785_v35 = vmax.f32 %v4006_v48, %v771_v28 }
  0x57   :  { %946 = vmatprep.subr.bf16.mxu1 %v3280_v22  ;;  %v827_v22 = vadd.f32 %v826_v23, %v781_v55 }
  0x58   :  { %3082 = vmatpush3.bf16.msra.mxu0 %v3271_v58  ;;  %v715_v58 = vld [vmem:[%s4887_s4 + $0x68] sm:$0xff]  ;;  %v787_v47 = vmax.f32 %v785_v35, %v773_v45 }
  0x59   :  { %1078 = vmatprep.subr.bf16.mxu0 %v3277_v24  ;;  %v708_v24 = vld [vmem:[%s4887_s4 + $0x30] sm:$0xff]  ;;  %v782_v51 = vmul.f32 %v715_v58, %v3770_v56  ;;  %v709_v56 = vld [vmem:[%s4887_s4 + $0x38] sm:$0xff] }
  0x5a   :  { %947 = vmatpush1.bf16.msra.mxu1 %v3278_v62  ;;  %v814_v62 = vadd.f32 %v813_v20, %v773_v45 }
  0x5b   :  { %948 = vmatprep.subr.bf16.mxu1 %v3286_v30  ;;  %v217_v30 = vld [vmem:[%s4889_s10] sm:$0x3]  ;;  %v828_v38 = vadd.f32 %v827_v22, %v782_v51  ;;  %v3289_v22 = vld [vmem:[%s4886_s14 + $0x54] ss:$8 sps:$4 sm:$0xff]  }
  0x5c   :  { %v815_v4 = vadd.f32 %v814_v62, %v774_v21  ;;  %v461_v48 = vrot.slane %v217_v30, %v4023_v27  ;;  %v3281_v62 = vld [vmem:[%s4886_s14 + $0x60] ss:$8 sps:$4 sm:$0xff]  }
  0x5e   :  { %949 = vmatpush1.bf16.msra.mxu1 %v3284_v25 }
  0x5f   :  { %950 = vmatprep.subr.bf16.mxu1 %v3292_v29  ;;  %v775_v29 = vmul.f32 %v708_v24, %v3752_v50  ;;  %v457_v50 = vrot.slane %v217_v30, %v4043_v15 }
  0x61   :  { %v789_v6 = vmax.f32 %v787_v47, %v775_v29  ;;  %v3299_v47 = vld [vmem:[%s4886_s14 + $0x30] ss:$8 sps:$4 sm:$0xff]  }
  0x62   :  { %951 = vmatpush1.bf16.msra.mxu1 %v3290_v63 }
  0x63   :  { %952 = vmatprep.subr.bf16.mxu1 %v3298_v42  ;;  %v786_v42 = vmax.f32 %v4009_v53, %v772_v9  ;;  %v776_v53 = vmul.f32 %v709_v56, %v3709_v36 }
  0x65   :  { %v788_v59 = vmax.f32 %v786_v42, %v774_v21  ;;  %v3283_v21 = vld [vmem:[%s4886_s14 + $0x64] ss:$8 sps:$4 sm:$0xff]  }
  0x66   :  { %953 = vmatpush1.bf16.msra.mxu1 %v3296_v33  ;;  %v783_v33 = vmul.f32 %v716_v34, %v3798_v5 }
  0x67   :  { %954 = vmatprep.subr.bf16.mxu1 %v3304_v37  ;;  %v798_v37 = vmax.f32 %v4012_v49, %v779_v61  ;;  %v801_v49 = vmax.f32 %v799_v43, %v782_v51  ;;  %v816_v61 = vadd.f32 %v815_v4, %v775_v29  ;;  %v3287_v29 = vld [vmem:[%s4886_s14 + $0x50] ss:$8 sps:$4 sm:$0xff]   ;;  %v3293_v43 = vld [vmem:[%s4886_s14 + $0x40] ss:$8 sps:$4 sm:$0xff]   ;;  %v3301_v4 = vld [vmem:[%s4886_s14 + $0x34] ss:$8 sps:$4 sm:$0xff]  }
  0x68   :  { %v829_v12 = vadd.f32 %v828_v38, %v783_v33 }
  0x69   :  { %v800_v28 = vmax.f32 %v798_v37, %v781_v55  ;;  %v817_v13 = vadd.f32 %v816_v61, %v776_v53 }
  0x6a   :  { %955 = vmatpush1.bf16.msra.mxu1 %v3302_v3  ;;  %v717_v3 = vld [vmem:[%s4887_s4 + $0x78] sm:$0xff] }
  0x6b   :  { %3087 = vmatprep.subr.bf16.mxu1 %v4908_v44  ;;  %v784_v54 = vmul.f32 %v717_v3, %v3775_v57  ;;  %v802_v11 = vmax.f32 %v800_v28, %v783_v33  ;;  %v818_v55 = vrot.slane %v817_v13, 4  ;;  %v3295_v33 = vld [vmem:[%s4886_s14 + $0x44] ss:$8 sps:$4 sm:$0xff]   ;;  %v3305_v28 = vld [vmem:[%s4886_s14 + $0x20] ss:$8 sps:$4 sm:$0xff]  }
  0x6d   :  { %973 = vmatmul.mubr.bf16.vlgmr.msra.gmra.mxu1 %v3900_v26  ;;  %v803_v36 = vmax.f32 %v801_v49, %v784_v54  ;;  %v830_v57 = vadd.f32 %v829_v12, %v784_v54  ;;  %v819_v34 = vadd.f32 %v818_v55, %v817_v13  ;;  %v3310_v49 = vld [vmem:[%s4886_s14 + $0x14] ss:$8 sps:$4 sm:$0xff]   ;;  %v3316_v13 = vld [vmem:[%s4890_s17 + $0x28] sm:$0xff]  }
  0x6e   :  { %3103 = vmatprep.mubr.msk.bf16.mxu1 %vm3477_vm3, %v4908_v44 }
  0x6f   :  { %v804_v45 = vmax.f32 %v802_v11, %v803_v36  ;;  %v831_v20 = vrot.slane %v830_v57, 4  ;;  %v820_v35 = vrot.slane %v819_v34, 2  ;;  %v3314_v11 = vld [vmem:[%s4890_s17 + $0x38] sm:$0xff]   ;;  %v3315_v36 = vld [vmem:[%s4890_s17 + $0x30] sm:$0xff]  }
  0x70   :  { %3088 = vmatpush3.bf16.msra.mxu1 %v3314_v11  ;;  %v4225_v11 = vld [vmem:[%s4895_s1 + $0x28] sm:$0xff]  }
  0x71   :  { %v805_v24 = vrot.slane %v804_v45, 4  ;;  %v832_v51 = vadd.f32 %v831_v20, %v830_v57  ;;  %v821_v3 = vadd.f32 %v820_v35, %v819_v34  ;;  %3089 = vmatprep.subr.bf16.mxu1 %v4908_v44  ;;  %v750_v57 = vld [vmem:[%s4891_s15] sm:$0x3]  ;;  %v3319_v34 = vld [vmem:[%s4890_s17 + $0x10] sm:$0xff]  }
  0x73   :  { %v806_v30 = vmax.f32 %v804_v45, %v805_v24  ;;  %v3318_v45 = vld [vmem:[%s4890_s17 + $0x18] sm:$0xff]  }
  0x74   :  { %3090 = vmatpush3.bf16.msra.mxu1 %v3315_v36  ;;  %v3328_v36 = vld [vmem:[%s4923_s2 + $0xf0] ss:$8 sps:$4 sm:$0xff]  }
  0x75   :  { %v807_v56 = vrot.slane %v806_v30, 2  ;;  %3091 = vmatprep.subr.bf16.mxu1 %v4908_v44 }
  0x78   :  { %3092 = vmatpush3.bf16.msra.mxu1 %v3316_v13  ;;  %v3330_v13 = vld [vmem:[%s4923_s2 + $0xf4] ss:$8 sps:$4 sm:$0xff]  }
  0x79   :  { %3093 = vmatprep.subr.bf16.mxu1 %v4908_v44 }
  0xfb   :  { %v440_v0 = vpop.f32.mrf.mxu0 }
  0xfc   :  { %v441_v25 = vadd.f32 %v440_v0, %v319_v2  ;;  %v3275_v2 = vld [vmem:[%s4886_s14 + $0x70] ss:$8 sps:$4 sm:$0xff]  }
  0xfd   :  { %v442_v8 = vpop.f32.mrf.mxu0 }
  0xfe   :  { %v443_v17 = vadd.f32 %v442_v8, %v323_v41  ;;  %v449_v46 = vmul.f32 0.2, %v441_v25  ;;  %vm447_vm5 = vcmp.ge.f32.partialorder %v441_v25, 0.0  ;;  %v790_v8 = vmax.f32 %v788_v59, %v776_v53 }
  0xff   :  { %v444_v18 = vpop.f32.mrf.mxu0 }
 0x100   :  { %v450_v16 = vmul.f32 0.2, %v443_v17  ;;  %vm448_vm4 = vcmp.ge.f32.partialorder %v443_v17, 0.0  ;;  %v451_v39 = vsel %vm447_vm5, %v441_v25, %v449_v46  ;;  %v808_v46 = vmax.f32 %v806_v30, %v807_v56 }
 0x101   :  { %v445_v52 = vpop.f32.mrf.mxu0 }
 0x102   :  { %v452_v63 = vsel %vm448_vm4, %v443_v17, %v450_v16  ;;  %v791_v52 = vmax.f32 %v789_v6, %v790_v8  ;;  %v809_v54 = vrot.slane %v808_v46, 1 }
 0x103   :  { %v592_v5 = vrot.slane %v452_v63, 2  ;;  %v833_v63 = vrot.slane %v832_v51, 2 }
 0x104   :  { %v792_v58 = vrot.slane %v791_v52, 4  ;;  %v810_v12 = vmax.f32 %v808_v46, %v809_v54 }
 0x105   :  { %v594_v0 = vadd.f32 %v592_v5, %v451_v39  ;;  %v834_v37 = vadd.f32 %v833_v63, %v832_v51  ;;  %v3320_v51 = vld [vmem:[%s4890_s17 + $0x8] sm:$0xff]  }
 0x106   :  { %v793_v25 = vmax.f32 %v791_v52, %v792_v58 }
 0x107   :  { %v835_v5 = vrot.slane %v834_v37, 1 }
 0x108   :  { %v794_v42 = vrot.slane %v793_v25, 2 }
 0x10a   :  { %v795_v38 = vmax.f32 %v793_v25, %v794_v42 }
 0x10c   :  { %v796_v53 = vrot.slane %v795_v38, 1 }
 0x10d   :  { %v578_v60 = vpop.f32.mrf.mxu1 }
 0x10e   :  { %v579_v40 = vadd.f32 %v578_v60, %v457_v50  ;;  %v822_v50 = vrot.slane %v821_v3, 1  ;;  %v836_v60 = vadd.f32 %v835_v5, %v834_v37  ;;  %v797_v61 = vmax.f32 %v795_v38, %v796_v53  ;;  %v751_v37 = vld [vmem:[%s4893_s16] sm:$0x3]  ;;  %v4191_v53 = vld [vmem:[%s4894_s20 + $0x2] ss:$0 sm:$0xff] }
 0x10f   :  { %v580_v7 = vpop.f32.mrf.mxu1  ;;  %v4186_v5 = vld [vmem:[%s4894_s20 + $0x1] ss:$0 sm:$0xff] }
 0x110   :  { %vm585_vm6 = vcmp.ge.f32.partialorder %v579_v40, 0.0  ;;  %v587_v31 = vmul.f32 0.2, %v579_v40  ;;  %v581_v41 = vadd.f32 %v580_v7, %v461_v48  ;;  %v3307_v48 = vld [vmem:[%s4886_s14 + $0x24] ss:$8 sps:$4 sm:$0xff]   ;;  %v823_v59 = vadd.f32 %v822_v50, %v821_v3 }
 0x111   :  { %v582_v9 = vpop.f32.mrf.mxu1  ;;  %v3313_v7 = vld [vmem:[%s4886_s14 + $0x4] ss:$8 sps:$4 sm:$0xff]   ;;  %v841_v6 = vsel %vm157_vm1, %v810_v12, %v797_v61 }
 0x112   :  { %v589_v14 = vsel %vm585_vm6, %v579_v40, %v587_v31  ;;  %vm586_vm7 = vcmp.ge.f32.partialorder %v581_v41, 0.0  ;;  %v588_v18 = vmul.f32 0.2, %v581_v41  ;;  %v837_v39 = vmul.f32 0.015625, %v823_v59 }
 0x113   :  { %v595_v19 = vadd.f32 %v594_v0, %v589_v14  ;;  %v583_v10 = vpop.f32.mrf.mxu1  ;;  %v838_v40 = vmul.f32 0.015625, %v836_v60  ;;  %v3308_v0 = vld [vmem:[%s4886_s14 + $0x10] ss:$8 sps:$4 sm:$0xff]  }
 0x114   :  { %v590_v17 = vsel %vm586_vm7, %v581_v41, %v588_v18  ;;  %v3311_v41 = vld [vmem:[%s4886_s14] ss:$8 sps:$4 sm:$0xff]   ;;  %v857_v10 = vrot.slane %v750_v57, %v4023_v27 }
 0x115   :  { %v597_v32 = vrot.slane %v590_v17, 2  ;;  %v845_v31 = vsel %vm162_vm0, %v838_v40, %v837_v39  ;;  %v3317_v18 = vld [vmem:[%s4890_s17 + $0x20] sm:$0xff]  }
 0x116   :  { %v847_v8 = vsel %vm165_vm2, %v841_v6, %v845_v31  ;;  %3094 = vmatpush3.bf16.msra.mxu1 %v3317_v18  ;;  %v3332_v18 = vld [vmem:[%s4923_s2 + $0xe0] ss:$8 sps:$4 sm:$0xff]  }
 0x117   :  { %v599_v23 = vadd.f32 %v597_v32, %v595_v19  ;;  %v848_v9 = vpack.c.bf16 %v847_v8, %v847_v8  ;;  %v853_v19 = vrot.slane %v750_v57, %v4043_v15  ;;  %3095 = vmatprep.subr.bf16.mxu1 %v4908_v44  ;;  %v4211_v8 = vld [vmem:[%s4895_s1 + $0x38] sm:$0xff]   ;;  %v3334_v57 = vld [vmem:[%s4923_s2 + $0xe4] ss:$8 sps:$4 sm:$0xff]  }
 0x119   :  { %v600_v16 = vpack.c.bf16 %v599_v23, %v599_v23 }
 0x11a   :  { %3096 = vmatpush3.bf16.msra.mxu1 %v3318_v45  ;;  %v4277_v45 = vld [vmem:[%s4895_s1] sm:$0xff]  }
 0x11b   :  { %3084 = vmatmul.mubr.bf16.vlgmr.msra.gmra.mxu0 %v600_v16  ;;  %3097 = vmatprep.subr.bf16.mxu1 %v4908_v44 }
 0x11c   :  { %1079 = vmatpush1.bf16.msra.mxu0 %v3275_v2  ;;  %1110 = vmatprep.mubr.bf16.mxu0 %v4910_v1 }
 0x11d   :  { %1080 = vmatprep.subr.bf16.mxu0 %v3283_v21 }
 0x11e   :  { %3098 = vmatpush3.bf16.msra.mxu1 %v3319_v34  ;;  %v3362_v34 = vld [vmem:[%s4923_s2 + $0x94] ss:$8 sps:$4 sm:$0xff]  }
 0x11f   :  { %3099 = vmatprep.subr.bf16.mxu1 %v4908_v44 }
 0x120   :  { %1081 = vmatpush1.bf16.msra.mxu0 %v3281_v62  ;;  %v3321_v62 = vld [vmem:[%s4890_s17] sm:$0xff]  }
 0x121   :  { %1082 = vmatprep.subr.bf16.mxu0 %v3289_v22  ;;  %v2712_v22 = vld [vmem:[%s4892_s12] ss:$0 sm:$0xff] }
 0x122   :  { %3100 = vmatpush3.bf16.msra.mxu1 %v3320_v51  ;;  %v3366_v51 = vld [vmem:[%s4923_s2 + $0x80] ss:$8 sps:$4 sm:$0xff]  }
 0x123   :  { %3101 = vmatprep.subr.bf16.mxu1 %v4908_v44 }
 0x124   :  { %1083 = vmatpush1.bf16.msra.mxu0 %v3287_v29 }
 0x125   :  { %1084 = vmatprep.subr.bf16.mxu0 %v3295_v33 }
 0x126   :  { %3102 = vmatpush3.bf16.msra.mxu1 %v3321_v62  ;;  %v3368_v62 = vld [vmem:[%s4923_s2 + $0x84] ss:$8 sps:$4 sm:$0xff]  }
 0x127   :  { %1635 = vmatprep.subr.bf16.mxu1 %v3330_v13  ;;  %v2777_v13 = vld [vmem:[%s4887_s4 + $0x98] sm:$0xff] }
 0x128   :  { %1085 = vmatpush1.bf16.msra.mxu0 %v3293_v43  ;;  %v991_v43 = vrot.slane %v751_v37, %v4043_v15 }
 0x129   :  { %1086 = vmatprep.subr.bf16.mxu0 %v3301_v4  ;;  %v995_v4 = vrot.slane %v751_v37, %v4023_v27  ;;  %v2782_v37 = vld [vmem:[%s4887_s4 + $0xc0] sm:$0xff] }
 0x12c   :  { %1087 = vmatpush1.bf16.msra.mxu0 %v3299_v47 }
 0x12d   :  { %1088 = vmatprep.subr.bf16.mxu0 %v3307_v48  ;;  %v974_v14 = vpop.f32.mrf.mxu1 }
 0x12e   :  { %v975_v52 = vadd.f32 %v974_v14, %v853_v19  ;;  %v4240_v14 = vld [vmem:[%s4895_s1 + $0x20] sm:$0xff]   ;;  %v3338_v19 = vld [vmem:[%s4923_s2 + $0xd4] ss:$8 sps:$4 sm:$0xff]  }
 0x12f   :  { %v976_v17 = vpop.f32.mrf.mxu1 }
 0x130   :  { %1089 = vmatpush1.bf16.msra.mxu0 %v3305_v28  ;;  %v977_v32 = vadd.f32 %v976_v17, %v857_v10  ;;  %vm981_vm8 = vcmp.ge.f32.partialorder %v975_v52, 0.0  ;;  %v983_v20 = vmul.f32 0.2, %v975_v52  ;;  %v4253_v10 = vld [vmem:[%s4895_s1 + $0x18] sm:$0xff]  }
 0x131   :  { %1090 = vmatprep.subr.bf16.mxu0 %v3310_v49  ;;  %v978_v55 = vpop.f32.mrf.mxu1  ;;  %v3336_v17 = vld [vmem:[%s4923_s2 + $0xd0] ss:$8 sps:$4 sm:$0xff]  }
 0x132   :  { %vm982_vm9 = vcmp.ge.f32.partialorder %v977_v32, 0.0  ;;  %v984_v23 = vmul.f32 0.2, %v977_v32  ;;  %v985_v58 = vsel %vm981_vm8, %v975_v52, %v983_v20  ;;  %v4263_v52 = vld [vmem:[%s4895_s1 + $0x10] sm:$0xff]   ;;  %v3342_v20 = vld [vmem:[%s4923_s2 + $0xc0] ss:$8 sps:$4 sm:$0xff]  }
 0x133   :  { %v979_v2 = vpop.f32.mrf.mxu1  ;;  %v3341_v55 = vld [vmem:[%s4886_s14 + $0xf4] ss:$8 sps:$4 sm:$0xff]  }
 0x134   :  { %1091 = vmatpush1.bf16.msra.mxu0 %v3308_v0  ;;  %v986_v16 = vsel %vm982_vm9, %v977_v32, %v984_v23  ;;  %v4270_v32 = vld [vmem:[%s4895_s1 + $0x8] sm:$0xff]   ;;  %v3348_v2 = vld [vmem:[%s4923_s2 + $0xb0] ss:$8 sps:$4 sm:$0xff]  }
 0x135   :  { %1092 = vmatprep.subr.bf16.mxu0 %v3313_v7  ;;  %v1126_v21 = vrot.slane %v986_v16, 2  ;;  %v3344_v23 = vld [vmem:[%s4923_s2 + $0xc4] ss:$8 sps:$4 sm:$0xff]   ;;  %v3354_v16 = vld [vmem:[%s4923_s2 + $0xa0] ss:$8 sps:$4 sm:$0xff]  }
 0x137   :  { %v1128_v24 = vadd.f32 %v1126_v21, %v985_v58  ;;  %v3350_v58 = vld [vmem:[%s4923_s2 + $0xb4] ss:$8 sps:$4 sm:$0xff]   ;;  %v3356_v21 = vld [vmem:[%s4923_s2 + $0xa4] ss:$8 sps:$4 sm:$0xff]  }
 0x138   :  { %1093 = vmatpush1.bf16.msra.mxu0 %v3311_v41 }
 0x139   :  { %3107 = vmatprep.subr.bf16.mxu0 %v4908_v44 }
 0x13b   :  { %1111 = vmatmul.mubr.bf16.vlgmr.msra.gmra.mxu0 %v848_v9  ;;  %v4218_v9 = vld [vmem:[%s4895_s1 + $0x30] sm:$0xff]  }
 0x13c   :  { %3123 = vmatprep.mubr.msk.bf16.mxu0 %vm3477_vm3, %v4908_v44  ;;  %3108 = vmatpush3.bf16.msra.mxu0 %v4211_v8 }
 0x13d   :  { %3109 = vmatprep.subr.bf16.mxu0 %v4908_v44 }
 0x140   :  { %3110 = vmatpush3.bf16.msra.mxu0 %v4218_v9 }
 0x141   :  { %3111 = vmatprep.subr.bf16.mxu0 %v4908_v44 }
 0x144   :  { %3112 = vmatpush3.bf16.msra.mxu0 %v4225_v11 }
 0x145   :  { %3113 = vmatprep.subr.bf16.mxu0 %v4908_v44 }
 0x148   :  { %3114 = vmatpush3.bf16.msra.mxu0 %v4240_v14 }
 0x149   :  { %3115 = vmatprep.subr.bf16.mxu0 %v4908_v44 }
 0x14c   :  { %3116 = vmatpush3.bf16.msra.mxu0 %v4253_v10 }
 0x14d   :  { %3117 = vmatprep.subr.bf16.mxu0 %v4908_v44 }
 0x150   :  { %3118 = vmatpush3.bf16.msra.mxu0 %v4263_v52 }
 0x151   :  { %3119 = vmatprep.subr.bf16.mxu0 %v4908_v44 }
 0x154   :  { %3120 = vmatpush3.bf16.msra.mxu0 %v4270_v32 }
 0x155   :  { %3121 = vmatprep.subr.bf16.mxu0 %v4908_v44 }
 0x158   :  { %3122 = vmatpush3.bf16.msra.mxu0 %v4277_v45 }
 0x159   :  { %1773 = vmatprep.subr.bf16.mxu0 %v3341_v55 }
 0x1db   :  { %v689_v25 = vpop.f32.mrf.mxu0 }
 0x1dc   :  { %v690_v30 = vadd.f32 %v2712_v22, %v689_v25  ;;  %v2753_v22 = vld [vmem:[%s4896_s18] ss:$0 sm:$0xff] }
 0x1dd   :  { %v3085_v35 = vpop.f32.mrf.mxu0 }
 0x1de   :  { %v695_v63 = vsub.f32 0.0, %v690_v30 }
 0x1df   :  { %v692_v29 = vpop.f32.mrf.mxu0 }
 0x1e0   :  { %v696_v33 = vmul.f32 1.442695, %v695_v63 }
 0x1e1   :  { %v3086_v42 = vpop.f32.mrf.mxu0 }
 0x1e2   :  { %3442 = vpow2.f32 %v696_v33 }
 0x1ef   :  { %v3443_v56 = vpop.eup %3442 }
 0x1f0   :  { %v698_v3 = vadd.f32 1.0, %v3443_v56  ;;  %v2774_v56 = vld [vmem:[%s4887_s4 + $0x80] sm:$0xff] }
 0x1f2   :  { %3444 = vrcp.f32 %v698_v3  ;;  %v2775_v3 = vld [vmem:[%s4887_s4 + $0x88] sm:$0xff] }
 0x1fb   :  { %v1112_v38 = vpop.f32.mrf.mxu0 }
 0x1fc   :  { %v1113_v46 = vadd.f32 %v1112_v38, %v991_v43  ;;  %v2783_v43 = vld [vmem:[%s4887_s4 + $0xc8] sm:$0xff] }
 0x1fd   :  { %v1114_v50 = vpop.f32.mrf.mxu0 }
 0x1fe   :  { %vm1119_vm10 = vcmp.ge.f32.partialorder %v1113_v46, 0.0  ;;  %v1121_v47 = vmul.f32 0.2, %v1113_v46  ;;  %v1115_v48 = vadd.f32 %v1114_v50, %v995_v4  ;;  %v4336_v4 = vld [vmem:[%s4920_s27] sm:$0xff] }
 0x1ff   :  { %v4193_v54 = vpop.eup %3444  ;;  %v1116_v59 = vpop.f32.mrf.mxu0  ;;  %v4339_v38 = vmul.f32 %v4336_v4, %v2774_v56  ;;  %v4435_v56 = vld [vmem:[%s4920_s27 + $0x68] sm:$0xff] }
 0x200   :  { %v1123_v60 = vsel %vm1119_vm10, %v1113_v46, %v1121_v47  ;;  %vm1120_vm11 = vcmp.ge.f32.partialorder %v1115_v48, 0.0  ;;  %v1122_v28 = vmul.f32 0.2, %v1115_v48  ;;  %v4197_v61 = vmul.f32 %v4193_v54, %v4186_v5  ;;  %v4344_v46 = vld [vmem:[%s4920_s27 + $0x8] sm:$0xff]  ;;  %v4350_v47 = vld [vmem:[%s4920_s27 + $0x40] sm:$0xff] }
 0x201   :  { %v1117_v49 = vpop.f32.mrf.mxu0  ;;  %v4201_v12 = vmul.f32 %v4193_v54, %v4191_v53  ;;  %v1129_v40 = vadd.f32 %v1128_v24, %v1123_v60  ;;  %v3360_v24 = vld [vmem:[%s4923_s2 + $0x90] ss:$8 sps:$4 sm:$0xff]   ;;  %v1465_v50 = vmul.f32 %v4344_v46, %v2775_v3  ;;  %v4356_v59 = vld [vmem:[%s4920_s27 + $0x48] sm:$0xff] }
 0x202   :  { %v1124_v39 = vsel %vm1120_vm11, %v1115_v48, %v1122_v28  ;;  %v1472_v48 = vmul.f32 %v4350_v47, %v2782_v37  ;;  %v1473_v60 = vmul.f32 %v4356_v59, %v2783_v43  ;;  %v2776_v28 = vld [vmem:[%s4887_s4 + $0x90] sm:$0xff] }
 0x203   :  { %v1131_v0 = vrot.slane %v1124_v39, 2  ;;  %v2784_v49 = vld [vmem:[%s4887_s4 + $0xd0] sm:$0xff] }
 0x204   :  { %v4368_v39 = vld [vmem:[%s4920_s27 + $0x10] sm:$0xff] }
 0x205   :  { %v1133_v31 = vadd.f32 %v1131_v0, %v1129_v40  ;;  %v1466_v40 = vmul.f32 %v4368_v39, %v2776_v28  ;;  %v4374_v0 = vld [vmem:[%s4920_s27 + $0x50] sm:$0xff] }
 0x206   :  { %v4441_v28 = vld [vmem:[%s4920_s27 + $0x30] sm:$0xff] }
 0x207   :  { %v1134_v41 = vpack.c.bf16 %v1133_v31, %v1133_v31  ;;  %v1474_v31 = vmul.f32 %v4374_v0, %v2784_v49 }
 0x209   :  { %3104 = vmatmul.mubr.bf16.vlgmr.msra.gmra.mxu1 %v1134_v41  ;;  %v1506_v41 = vadd.f32 %v1465_v50, %v4339_v38 }
 0x20a   :  { %1667 = vmatprep.mubr.bf16.mxu1 %v4910_v1  ;;  %1636 = vmatpush1.bf16.msra.mxu1 %v3328_v36  ;;  %v1519_v36 = vadd.f32 %v1473_v60, %v1472_v48 }
 0x20b   :  { %1637 = vmatprep.subr.bf16.mxu1 %v3334_v57  ;;  %v2785_v57 = vld [vmem:[%s4887_s4 + $0xd8] sm:$0xff] }
 0x20e   :  { %1638 = vmatpush1.bf16.msra.mxu1 %v3332_v18  ;;  %v4387_v18 = vld [vmem:[%s4920_s27 + $0x18] sm:$0xff] }
 0x20f   :  { %1639 = vmatprep.subr.bf16.mxu1 %v3338_v19  ;;  %v1467_v19 = vmul.f32 %v4387_v18, %v2777_v13  ;;  %v1480_v13 = vmax.f32 %v4339_v38, %v1466_v40  ;;  %v4463_v38 = vld [vmem:[%s4920_s27 + $0x38] sm:$0xff] }
 0x212   :  { %1640 = vmatpush1.bf16.msra.mxu1 %v3336_v17  ;;  %v4393_v17 = vld [vmem:[%s4920_s27 + $0x58] sm:$0xff] }
 0x213   :  { %1641 = vmatprep.subr.bf16.mxu1 %v3344_v23  ;;  %v1475_v55 = vmul.f32 %v4393_v17, %v2785_v57  ;;  %v1520_v23 = vadd.f32 %v1519_v36, %v1474_v31  ;;  %v1481_v57 = vmax.f32 %v1465_v50, %v1467_v19 }
 0x216   :  { %1642 = vmatpush1.bf16.msra.mxu1 %v3342_v20  ;;  %v1507_v20 = vadd.f32 %v1506_v41, %v1466_v40  ;;  %v4447_v41 = vld [vmem:[%s4920_s27 + $0x70] sm:$0xff]  ;;  %v4469_v40 = vld [vmem:[%s4920_s27 + $0x78] sm:$0xff] }
 0x217   :  { %1643 = vmatprep.subr.bf16.mxu1 %v3350_v58  ;;  %v2786_v58 = vld [vmem:[%s4887_s4 + $0xe0] sm:$0xff] }
 0x21a   :  { %1644 = vmatpush1.bf16.msra.mxu1 %v3348_v2  ;;  %v2778_v2 = vld [vmem:[%s4887_s4 + $0xa0] sm:$0xff] }
 0x21b   :  { %1645 = vmatprep.subr.bf16.mxu1 %v3356_v21 }
 0x21e   :  { %1646 = vmatpush1.bf16.msra.mxu1 %v3354_v16 }
 0x21f   :  { %1647 = vmatprep.subr.bf16.mxu1 %v3362_v34 }
 0x222   :  { %1648 = vmatpush1.bf16.msra.mxu1 %v3360_v24  ;;  %v4405_v24 = vld [vmem:[%s4920_s27 + $0x20] sm:$0xff] }
 0x223   :  { %1649 = vmatprep.subr.bf16.mxu1 %v3368_v62  ;;  %v1468_v34 = vmul.f32 %v4405_v24, %v2778_v2  ;;  %v1493_v2 = vmax.f32 %v1472_v48, %v1474_v31 }
 0x226   :  { %1650 = vmatpush1.bf16.msra.mxu1 %v3366_v51  ;;  %v4411_v51 = vld [vmem:[%s4920_s27 + $0x60] sm:$0xff] }
 0x227   :  { %3127 = vmatprep.subr.bf16.mxu1 %v4908_v44  ;;  %v1476_v62 = vmul.f32 %v4411_v51, %v2786_v58  ;;  %v1494_v58 = vmax.f32 %v1473_v60, %v1475_v55  ;;  %v1482_v60 = vmax.f32 %v1480_v13, %v1468_v34 }
 0x229   :  { %1668 = vmatmul.mubr.bf16.vlgmr.msra.gmra.mxu1 %v3900_v26 }
 0x22a   :  { %3143 = vmatprep.mubr.msk.bf16.mxu1 %vm3477_vm3, %v4908_v44 }
 0x2c9   :  { %v1223_v25 = vpop.f32.mrf.mxu1 }
 0x2ca   :  { %v1224_v30 = vadd.f32 %v2753_v22, %v1223_v25  ;;  %v1508_v22 = vadd.f32 %v1507_v20, %v1467_v19  ;;  %v1521_v25 = vadd.f32 %v1520_v23, %v1475_v55  ;;  %v2781_v20 = vld [vmem:[%s4887_s4 + $0xb8] sm:$0xff]  ;;  %v2762_v19 = vld [vmem:[%s4897_s19] ss:$0 sm:$0xff]  ;;  %v1495_v55 = vmax.f32 %v1493_v2, %v1476_v62 }
 0x2cb   :  { %v3105_v35 = vpop.f32.mrf.mxu1  ;;  %v2789_v23 = vld [vmem:[%s4887_s4 + $0xf8] sm:$0xff]  ;;  %v1471_v50 = vmul.f32 %v4463_v38, %v2781_v20 }
 0x2cc   :  { %v1229_v63 = vsub.f32 0.0, %v1224_v30  ;;  %v2779_v30 = vld [vmem:[%s4887_s4 + $0xa8] sm:$0xff]  ;;  %v1509_v37 = vadd.f32 %v1508_v22, %v1468_v34  ;;  %v1522_v43 = vadd.f32 %v1521_v25, %v1476_v62  ;;  %v2763_v22 = vld [vmem:[%s4894_s20] ss:$0 sm:$0xff]  ;;  %v1479_v48 = vmul.f32 %v4469_v40, %v2789_v23 }
 0x2cd   :  { %v1226_v29 = vpop.f32.mrf.mxu1  ;;  %v2787_v35 = vld [vmem:[%s4887_s4 + $0xe8] sm:$0xff] }
 0x2ce   :  { %v1230_v33 = vmul.f32 1.442695, %v1229_v63  ;;  %v2780_v63 = vld [vmem:[%s4887_s4 + $0xb0] sm:$0xff]  ;;  %v1477_v3 = vmul.f32 %v4435_v56, %v2787_v35 }
 0x2cf   :  { %v3106_v42 = vpop.f32.mrf.mxu1  ;;  %v2788_v29 = vld [vmem:[%s4887_s4 + $0xf0] sm:$0xff]  ;;  %v1470_v49 = vmul.f32 %v4441_v28, %v2780_v63  ;;  %v1250_v63 = vmul.f32 %v4193_v54, %v2763_v22 }
 0x2d0   :  { %3446 = vpow2.f32 %v1230_v33  ;;  %v4429_v33 = vld [vmem:[%s4920_s27 + $0x28] sm:$0xff]  ;;  %v1478_v36 = vmul.f32 %v4447_v41, %v2788_v29  ;;  %v1496_v25 = vmax.f32 %v1494_v58, %v1477_v3 }
 0x2d1   :  { %v1469_v42 = vmul.f32 %v4429_v33, %v2779_v30 }
 0x2d2   :  { %v1497_v6 = vmax.f32 %v1495_v55, %v1478_v36  ;;  %v1498_v7 = vmax.f32 %v1496_v25, %v1479_v48 }
 0x2d3   :  { %v1483_v31 = vmax.f32 %v1481_v57, %v1469_v42  ;;  %v1256_v57 = vrot.slane %v1250_v63, 4 }
 0x2d4   :  { %v1499_v62 = vmax.f32 %v1497_v6, %v1498_v7 }
 0x2d5   :  { %v1485_v20 = vmax.f32 %v1483_v31, %v1471_v50  ;;  %v4924_v31 = vmov 0  }
 0x2d6   :  { %v1500_v7 = vrot.slane %v1499_v62, 4 }
 0x2d8   :  { %v1501_v25 = vmax.f32 %v1499_v62, %v1500_v7  ;;  %v3363_v62 = vld [vmem:[%s4886_s14 + $0xb0] ss:$8 sps:$4 sm:$0xff]  }
 0x2dd   :  { %v3447_v16 = vpop.eup %3446 }
 0x2de   :  { %v1232_v21 = vadd.f32 1.0, %v3447_v16  ;;  %v1510_v16 = vadd.f32 %v1509_v37, %v1469_v42  ;;  %v1251_v42 = vsub.f32 %v2763_v22, %v1250_v63  ;;  %v3359_v63 = vld [vmem:[%s4886_s14 + $0xc4] ss:$8 sps:$4 sm:$0xff]  }
 0x2e0   :  { %3448 = vrcp.f32 %v1232_v21  ;;  %v1523_v21 = vadd.f32 %v1522_v43, %v1477_v3  ;;  %v1511_v30 = vadd.f32 %v1510_v16, %v1470_v49  ;;  %v1484_v43 = vmax.f32 %v1482_v60, %v1470_v49  ;;  %v3345_v60 = vld [vmem:[%s4886_s14 + $0xe0] ss:$8 sps:$4 sm:$0xff]  }
 0x2e1   :  { %v1259_v58 = vrot.slane %v1251_v42, 2 }
 0x2e2   :  { %v1524_v35 = vadd.f32 %v1523_v21, %v1478_v36  ;;  %v1512_v44 = vadd.f32 %v1511_v30, %v1471_v50  ;;  %v1486_v1 = vmax.f32 %v1484_v43, %v1485_v20  ;;  %v3339_v36 = vld [vmem:[%s4886_s14 + $0xf0] ss:$8 sps:$4 sm:$0xff]   ;;  %v3347_v50 = vld [vmem:[%s4886_s14 + $0xe4] ss:$8 sps:$4 sm:$0xff]  }
 0x2e4   :  { %v1525_v23 = vadd.f32 %v1524_v35, %v1479_v48  ;;  %v1513_v3 = vrot.slane %v1512_v44, 4  ;;  %v1487_v21 = vrot.slane %v1486_v1, 4 }
 0x2e6   :  { %v1526_v2 = vrot.slane %v1525_v23, 4  ;;  %v1514_v6 = vadd.f32 %v1513_v3, %v1512_v44  ;;  %v1488_v55 = vmax.f32 %v1486_v1, %v1487_v21  ;;  %v3351_v44 = vld [vmem:[%s4886_s14 + $0xd0] ss:$8 sps:$4 sm:$0xff]   ;;  %v3357_v1 = vld [vmem:[%s4886_s14 + $0xc0] ss:$8 sps:$4 sm:$0xff]  }
 0x2e7   :  { %v3371_v3 = vld [vmem:[%s4886_s14 + $0xa4] ss:$8 sps:$4 sm:$0xff]  }
 0x2e8   :  { %v1527_v48 = vadd.f32 %v1526_v2, %v1525_v23  ;;  %v1515_v30 = vrot.slane %v1514_v6, 2  ;;  %v3365_v23 = vld [vmem:[%s4886_s14 + $0xb4] ss:$8 sps:$4 sm:$0xff]  }
 0x2ea   :  { %v1528_v35 = vrot.slane %v1527_v48, 2  ;;  %v1516_v43 = vadd.f32 %v1515_v30, %v1514_v6  ;;  %v3372_v6 = vld [vmem:[%s4886_s14 + $0x90] ss:$8 sps:$4 sm:$0xff]  }
 0x2ec   :  { %v1529_v20 = vadd.f32 %v1528_v35, %v1527_v48  ;;  %v3377_v48 = vld [vmem:[%s4886_s14 + $0x84] ss:$8 sps:$4 sm:$0xff]   ;;  %v4925_v35 = vmov 0.0  }
 0x2ed   :  { %v3449_v29 = vpop.eup %3448 }
 0x2ee   :  { %v1242_v37 = vmul.f32 %v3449_v29, %v2762_v19  ;;  %v1489_v29 = vrot.slane %v1488_v55, 2 }
 0x2f0   :  { %v1243_v34 = vsub.f32 %v2762_v19, %v1242_v37  ;;  %v3353_v19 = vld [vmem:[%s4886_s14 + $0xd4] ss:$8 sps:$4 sm:$0xff]  }
 0x2f2   :  { %v1253_v13 = vrot.slane %v1243_v34, 6  ;;  %v1490_v34 = vmax.f32 %v1488_v55, %v1489_v29  ;;  %v3375_v55 = vld [vmem:[%s4886_s14 + $0x80] ss:$8 sps:$4 sm:$0xff]  }
 0x2f3   :  { %v2822_v29 = vld [vmem:[%s4891_s15 + $0x2] sm:$0x3] }
 0x2f4   :  { %v1261_v54 = vsel %vm165_vm2, %v1242_v37, %v1253_v13  ;;  %v1502_v37 = vrot.slane %v1501_v25, 2  ;;  %v1517_v13 = vrot.slane %v1516_v43, 1  ;;  %v1491_v2 = vrot.slane %v1490_v34, 1 }
 0x2f5   :  { %v1263_v49 = vsel %vm1262_vm12, %v1261_v54, %v1256_v57  ;;  %v1530_v57 = vrot.slane %v1529_v20, 1 }
 0x2f6   :  { %v1265_v16 = vsel %vm1264_vm13, %v1263_v49, %v1259_v58  ;;  %v1503_v42 = vmax.f32 %v1501_v25, %v1502_v37  ;;  %v1518_v54 = vadd.f32 %v1517_v13, %v1516_v43  ;;  %v1492_v21 = vmax.f32 %v1490_v34, %v1491_v2  ;;  %v1669_v37 = vpop.f32.mrf.mxu1 }
 0x2f7   :  { %v1266_v22 = vpack.c.bf16 %v1265_v16, %v1265_v16  ;;  %v1531_v49 = vadd.f32 %v1530_v57, %v1529_v20  ;;  %v3374_v16 = vld [vmem:[%s4886_s14 + $0x94] ss:$8 sps:$4 sm:$0xff]   ;;  %v1548_v43 = vrot.slane %v2822_v29, %v4043_v15  ;;  %v1552_v20 = vrot.slane %v2822_v29, %v4023_v27  ;;  %v4594_v29 = vld [vmem:[%s4900_s6] sm:$0x3] }
 0x2f8   :  { %v1504_v58 = vrot.slane %v1503_v42, 1  ;;  %v3382_v57 = vld [vmem:[%s4890_s17 + $0x58] sm:$0xff]  }
 0x2f9   :  { %3124 = vmatmul.mubr.bf16.vlgmr.msra.gmra.mxu0 %v1266_v22  ;;  %v1533_v7 = vmul.f32 0.015625, %v1531_v49  ;;  %v1670_v34 = vadd.f32 %v1669_v37, %v1548_v43 }
 0x2fa   :  { %1774 = vmatpush1.bf16.msra.mxu0 %v3339_v36  ;;  %1805 = vmatprep.mubr.bf16.mxu0 %v4924_v31  ;;  %v3369_v36 = vld [vmem:[%s4886_s14 + $0xa0] ss:$8 sps:$4 sm:$0xff]   ;;  %v1505_v22 = vmax.f32 %v1503_v42, %v1504_v58 }
 0x2fb   :  { %1775 = vmatprep.subr.bf16.mxu0 %v3347_v50  ;;  %v1532_v50 = vmul.f32 0.015625, %v1518_v54  ;;  %vm1676_vm14 = vcmp.ge.f32.partialorder %v1670_v34, 0.0 }
 0x2fe   :  { %1776 = vmatpush1.bf16.msra.mxu0 %v3345_v60  ;;  %v1536_v60 = vsel %vm157_vm1, %v1505_v22, %v1492_v21  ;;  %v3384_v21 = vld [vmem:[%s4890_s17 + $0x48] sm:$0xff]   ;;  %v3385_v22 = vld [vmem:[%s4890_s17 + $0x40] sm:$0xff]  }
 0x2ff   :  { %1777 = vmatprep.subr.bf16.mxu0 %v3353_v19  ;;  %v1540_v19 = vsel %vm162_vm0, %v1533_v7, %v1532_v50  ;;  %v4585_v50 = vld [vmem:[%s4898_s3] ss:$0 sm:$0xff] }
 0x300   :  { %v1542_v25 = vsel %vm165_vm2, %v1536_v60, %v1540_v19  ;;  %v2772_v7 = vld [vmem:[%s4899_s5] ss:$0 sm:$0xff] }
 0x301   :  { %v1543_v30 = vpack.c.bf16 %v1542_v25, %v1542_v25 }
 0x302   :  { %1778 = vmatpush1.bf16.msra.mxu0 %v3351_v44  ;;  %v3379_v44 = vld [vmem:[%s4890_s17 + $0x70] sm:$0xff]  }
 0x303   :  { %1779 = vmatprep.subr.bf16.mxu0 %v3359_v63  ;;  %v3380_v63 = vld [vmem:[%s4890_s17 + $0x68] sm:$0xff]  }
 0x306   :  { %1780 = vmatpush1.bf16.msra.mxu0 %v3357_v1  ;;  %v3381_v1 = vld [vmem:[%s4890_s17 + $0x60] sm:$0xff]  }
 0x307   :  { %1781 = vmatprep.subr.bf16.mxu0 %v3365_v23  ;;  %v1671_v23 = vpop.f32.mrf.mxu1 }
 0x308   :  { %v1672_v42 = vadd.f32 %v1671_v23, %v1552_v20 }
 0x309   :  { %v1673_v13 = vpop.f32.mrf.mxu1 }
 0x30a   :  { %1782 = vmatpush1.bf16.msra.mxu0 %v3363_v62  ;;  %v1678_v62 = vmul.f32 0.2, %v1670_v34  ;;  %vm1677_vm15 = vcmp.ge.f32.partialorder %v1672_v42, 0.0 }
 0x30b   :  { %1783 = vmatprep.subr.bf16.mxu0 %v3371_v3  ;;  %v1679_v3 = vmul.f32 0.2, %v1672_v42  ;;  %v1674_v2 = vpop.f32.mrf.mxu1 }
 0x30c   :  { %v1680_v58 = vsel %vm1676_vm14, %v1670_v34, %v1678_v62 }
 0x30d   :  { %v1681_v54 = vsel %vm1677_vm15, %v1672_v42, %v1679_v3  ;;  %v2823_v3 = vld [vmem:[%s4893_s16 + $0x2] sm:$0x3] }
 0x30e   :  { %1784 = vmatpush1.bf16.msra.mxu0 %v3369_v36  ;;  %v1821_v49 = vrot.slane %v1681_v54, 2  ;;  %v1686_v2 = vrot.slane %v2823_v3, %v4043_v15 }
 0x30f   :  { %1785 = vmatprep.subr.bf16.mxu0 %v3374_v16  ;;  %v3383_v16 = vld [vmem:[%s4890_s17 + $0x50] sm:$0xff]  }
 0x310   :  { %v1823_v36 = vadd.f32 %v1821_v49, %v1680_v58  ;;  %v1690_v58 = vrot.slane %v2823_v3, %v4023_v27  ;;  %v3418_v3 = vld [vmem:[%s4923_s2 + $0x114] ss:$8 sps:$4 sm:$0xff]  }
 0x312   :  { %1786 = vmatpush1.bf16.msra.mxu0 %v3372_v6 }
 0x313   :  { %1787 = vmatprep.subr.bf16.mxu0 %v3377_v48 }
 0x316   :  { %1788 = vmatpush1.bf16.msra.mxu0 %v3375_v55 }
 0x317   :  { %3147 = vmatprep.subr.bf16.mxu0 %v4925_v35 }
 0x319   :  { %1806 = vmatmul.mubr.bf16.vlgmr.msra.gmra.mxu0 %v1543_v30 }
 0x31a   :  { %3148 = vmatpush3.bf16.msra.mxu0 %v4211_v8  ;;  %3163 = vmatprep.mubr.msk.bf16.mxu0 %vm3477_vm3, %v4925_v35  ;;  %v3378_v8 = vld [vmem:[%s4890_s17 + $0x78] sm:$0xff]  }
 0x31b   :  { %3149 = vmatprep.subr.bf16.mxu0 %v4925_v35  ;;  %3128 = vmatpush3.bf16.msra.mxu1 %v3378_v8 }
 0x31c   :  { %3129 = vmatprep.subr.bf16.mxu1 %v4925_v35 }
 0x31e   :  { %3150 = vmatpush3.bf16.msra.mxu0 %v4218_v9 }
 0x31f   :  { %3151 = vmatprep.subr.bf16.mxu0 %v4925_v35  ;;  %3130 = vmatpush3.bf16.msra.mxu1 %v3379_v44 }
 0x320   :  { %3131 = vmatprep.subr.bf16.mxu1 %v4925_v35 }
 0x322   :  { %3152 = vmatpush3.bf16.msra.mxu0 %v4225_v11 }
 0x323   :  { %3153 = vmatprep.subr.bf16.mxu0 %v4925_v35  ;;  %3132 = vmatpush3.bf16.msra.mxu1 %v3380_v63 }
 0x324   :  { %3133 = vmatprep.subr.bf16.mxu1 %v4925_v35 }
 0x326   :  { %3154 = vmatpush3.bf16.msra.mxu0 %v4240_v14 }
 0x327   :  { %3155 = vmatprep.subr.bf16.mxu0 %v4925_v35  ;;  %3134 = vmatpush3.bf16.msra.mxu1 %v3381_v1 }
 0x328   :  { %3135 = vmatprep.subr.bf16.mxu1 %v4925_v35 }
 0x32a   :  { %3156 = vmatpush3.bf16.msra.mxu0 %v4253_v10 }
 0x32b   :  { %3157 = vmatprep.subr.bf16.mxu0 %v4925_v35  ;;  %3136 = vmatpush3.bf16.msra.mxu1 %v3382_v57 }
 0x32c   :  { %3137 = vmatprep.subr.bf16.mxu1 %v4925_v35 }
 0x32e   :  { %3158 = vmatpush3.bf16.msra.mxu0 %v4263_v52 }
 0x32f   :  { %3159 = vmatprep.subr.bf16.mxu0 %v4925_v35  ;;  %3138 = vmatpush3.bf16.msra.mxu1 %v3383_v16 }
 0x330   :  { %3139 = vmatprep.subr.bf16.mxu1 %v4925_v35 }
 0x332   :  { %3160 = vmatpush3.bf16.msra.mxu0 %v4270_v32 }
 0x333   :  { %3161 = vmatprep.subr.bf16.mxu0 %v4925_v35  ;;  %3140 = vmatpush3.bf16.msra.mxu1 %v3384_v21 }
 0x334   :  { %3141 = vmatprep.subr.bf16.mxu1 %v4925_v35 }
 0x336   :  { %3162 = vmatpush3.bf16.msra.mxu0 %v4277_v45 }
 0x337   :  { %3142 = vmatpush3.bf16.msra.mxu1 %v3385_v22 }
 0x3b9   :  { %v1349_v6 = vpop.f32.mrf.mxu0 }
 0x3ba   :  { %v1362_v48 = vmul.f32 %v2772_v7, %v1349_v6  ;;  %v1364_v60 = vrot.slane %v1349_v6, 2  ;;  %v1373_v19 = vmul.f32 %v4585_v50, %v1349_v6  ;;  %v1378_v63 = vrot.slane %v1349_v6, 6 }
 0x3bb   :  { %v3125_v55 = vpop.f32.mrf.mxu0 }
 0x3bc   :  { %v1366_v25 = vadd.f32 %v1364_v60, %v1362_v48  ;;  %v1375_v30 = vrot.slane %v1373_v19, 4 }
 0x3bd   :  { %v1352_v8 = vpop.f32.mrf.mxu0 }
 0x3be   :  { %v1377_v44 = vadd.f32 %v1375_v30, %v1366_v25 }
 0x3bf   :  { %v3126_v37 = vpop.f32.mrf.mxu0 }
 0x3c0   :  { %v1380_v43 = vadd.f32 %v1378_v63, %v1377_v44  ;;  %v3386_v44 = vld [vmem:[%s4923_s2 + $0x170] ss:$8 sps:$4 sm:$0xff]   ;;  %v3388_v63 = vld [vmem:[%s4923_s2 + $0x174] ss:$8 sps:$4 sm:$0xff]   ;;  %v3391_v37 = vld [vmem:[%s4923_s2 + $0x164] ss:$8 sps:$4 sm:$0xff]  }
 0x3c1   :  { %2278 = vmatprep.subr.bf16.mxu1 %v3388_v63 }
 0x3c2   :  { %v1381_v20 = vmul.f32 %v1380_v43, %v4594_v29  ;;  %v3389_v43 = vld [vmem:[%s4923_s2 + $0x160] ss:$8 sps:$4 sm:$0xff]  }
 0x3c4   :  { %v1382_v1 = vsel %vm165_vm2, %v1381_v20, 0.0  ;;  %v3394_v20 = vld [vmem:[%s4923_s2 + $0x154] ss:$8 sps:$4 sm:$0xff]  }
 0x3c5   :  { %v1383_v23 = vrot.slane %v1382_v1, 4 }
 0x3c7   :  { %v1384_v34 = vadd.f32 %v1383_v23, %v1382_v1  ;;  %v3392_v1 = vld [vmem:[%s4923_s2 + $0x150] ss:$8 sps:$4 sm:$0xff]   ;;  %v3400_v23 = vld [vmem:[%s4923_s2 + $0x144] ss:$8 sps:$4 sm:$0xff]  }
 0x3c9   :  { %v1385_v42 = vrot.slane %v1384_v34, 2 }
 0x3cb   :  { %v1386_v13 = vadd.f32 %v1385_v42, %v1384_v34  ;;  %v3398_v34 = vld [vmem:[%s4923_s2 + $0x140] ss:$8 sps:$4 sm:$0xff]   ;;  %v3406_v42 = vld [vmem:[%s4923_s2 + $0x134] ss:$8 sps:$4 sm:$0xff]  }
 0x3cd   :  { %v1387_v57 = vrot.slane %v1386_v13, 1 }
 0x3cf   :  { %v1388_v62 = vadd.f32 %v1387_v57, %v1386_v13  ;;  %v3404_v13 = vld [vmem:[%s4923_s2 + $0x130] ss:$8 sps:$4 sm:$0xff]   ;;  %v3412_v57 = vld [vmem:[%s4923_s2 + $0x124] ss:$8 sps:$4 sm:$0xff]  }
 0x3d1   :  { %1389 = vst [vmem:[%s4901_s21] sm:$0x1] %v1388_v62  ;;  %v3410_v62 = vld [vmem:[%s4923_s2 + $0x120] ss:$8 sps:$4 sm:$0xff]  }
 0x3d9   :  { %v1807_v54 = vpop.f32.mrf.mxu0 }
 0x3da   :  { %v1808_v49 = vadd.f32 %v1807_v54, %v1686_v2  ;;  %v3416_v2 = vld [vmem:[%s4923_s2 + $0x110] ss:$8 sps:$4 sm:$0xff]   ;;  %v3422_v54 = vld [vmem:[%s4923_s2 + $0x100] ss:$8 sps:$4 sm:$0xff]  }
 0x3db   :  { %v1809_v16 = vpop.f32.mrf.mxu0 }
 0x3dc   :  { %vm1814_vm4 = vcmp.ge.f32.partialorder %v1808_v49, 0.0  ;;  %v1816_v21 = vmul.f32 0.2, %v1808_v49  ;;  %v1810_v22 = vadd.f32 %v1809_v16, %v1690_v58  ;;  %v3424_v58 = vld [vmem:[%s4923_s2 + $0x104] ss:$8 sps:$4 sm:$0xff]  }
 0x3dd   :  { %v1811_v7 = vpop.f32.mrf.mxu0 }
 0x3de   :  { %v1818_v6 = vsel %vm1814_vm4, %v1808_v49, %v1816_v21  ;;  %vm1815_vm5 = vcmp.ge.f32.partialorder %v1810_v22, 0.0  ;;  %v1817_v48 = vmul.f32 0.2, %v1810_v22  ;;  %v2873_v49 = vld [vmem:[%s4896_s18 + $0x1] ss:$0 sm:$0xff] }
 0x3df   :  { %v1812_v60 = vpop.f32.mrf.mxu0  ;;  %v1824_v55 = vadd.f32 %v1823_v36, %v1818_v6  ;;  %v3397_v36 = vld [vmem:[%s4886_s14 + $0x174] ss:$8 sps:$4 sm:$0xff]  }
 0x3e0   :  { %v1819_v19 = vsel %vm1815_vm5, %v1810_v22, %v1817_v48  ;;  %2416 = vmatprep.subr.bf16.mxu0 %v3397_v36  ;;  %v2899_v36 = vld [vmem:[%s4887_s4 + $0x150] sm:$0xff] }
 0x3e1   :  { %v1826_v25 = vrot.slane %v1819_v19, 2  ;;  %v2889_v19 = vld [vmem:[%s4887_s4 + $0x100] sm:$0xff] }
 0x3e3   :  { %v1828_v30 = vadd.f32 %v1826_v25, %v1824_v55  ;;  %v2897_v55 = vld [vmem:[%s4887_s4 + $0x140] sm:$0xff]  ;;  %v2898_v25 = vld [vmem:[%s4887_s4 + $0x148] sm:$0xff] }
 0x3e4   :  { %v2116_v63 = vmul.f32 %v4356_v59, %v2898_v25 }
 0x3e5   :  { %v1829_v8 = vpack.c.bf16 %v1828_v30, %v1828_v30  ;;  %v2107_v30 = vmul.f32 %v4336_v4, %v2889_v19  ;;  %v2904_v19 = vld [vmem:[%s4887_s4 + $0x178] sm:$0xff] }
 0x3e7   :  { %3144 = vmatmul.mubr.bf16.vlgmr.msra.gmra.mxu1 %v1829_v8 }
 0x3e8   :  { %2310 = vmatprep.mubr.bf16.mxu1 %v4924_v31  ;;  %2279 = vmatpush1.bf16.msra.mxu1 %v3386_v44  ;;  %v2115_v44 = vmul.f32 %v4350_v47, %v2897_v55  ;;  %v2900_v47 = vld [vmem:[%s4887_s4 + $0x158] sm:$0xff] }
 0x3e9   :  { %2280 = vmatprep.subr.bf16.mxu1 %v3391_v37  ;;  %v2891_v37 = vld [vmem:[%s4887_s4 + $0x110] sm:$0xff] }
 0x3ea   :  { %v2162_v4 = vadd.f32 %v2116_v63, %v2115_v44 }
 0x3ec   :  { %2281 = vmatpush1.bf16.msra.mxu1 %v3389_v43  ;;  %v2109_v43 = vmul.f32 %v4368_v39, %v2891_v37  ;;  %v2893_v39 = vld [vmem:[%s4887_s4 + $0x120] sm:$0xff] }
 0x3ed   :  { %2282 = vmatprep.subr.bf16.mxu1 %v3394_v20  ;;  %v2117_v20 = vmul.f32 %v4374_v0, %v2899_v36  ;;  %v2901_v0 = vld [vmem:[%s4887_s4 + $0x160] sm:$0xff] }
 0x3f0   :  { %2283 = vmatpush1.bf16.msra.mxu1 %v3392_v1 }
 0x3f1   :  { %2284 = vmatprep.subr.bf16.mxu1 %v3400_v23  ;;  %v2118_v23 = vmul.f32 %v4393_v17, %v2900_v47  ;;  %v2894_v17 = vld [vmem:[%s4887_s4 + $0x128] sm:$0xff] }
 0x3f4   :  { %2285 = vmatpush1.bf16.msra.mxu1 %v3398_v34 }
 0x3f5   :  { %2286 = vmatprep.subr.bf16.mxu1 %v3406_v42  ;;  %v2163_v42 = vadd.f32 %v2162_v4, %v2117_v20 }
 0x3f8   :  { %2287 = vmatpush1.bf16.msra.mxu1 %v3404_v13 }
 0x3f9   :  { %2288 = vmatprep.subr.bf16.mxu1 %v3412_v57 }
 0x3fc   :  { %2289 = vmatpush1.bf16.msra.mxu1 %v3410_v62  ;;  %v2111_v62 = vmul.f32 %v4405_v24, %v2893_v39  ;;  %v2903_v24 = vld [vmem:[%s4887_s4 + $0x170] sm:$0xff] }
 0x3fd   :  { %2290 = vmatprep.subr.bf16.mxu1 %v3418_v3  ;;  %v2119_v3 = vmul.f32 %v4411_v51, %v2901_v0  ;;  %v2112_v51 = vmul.f32 %v4429_v33, %v2894_v17  ;;  %v2137_v33 = vmax.f32 %v2116_v63, %v2118_v23 }
 0x400   :  { %2291 = vmatpush1.bf16.msra.mxu1 %v3416_v2 }
 0x401   :  { %2292 = vmatprep.subr.bf16.mxu1 %v3424_v58  ;;  %v2902_v58 = vld [vmem:[%s4887_s4 + $0x168] sm:$0xff] }
 0x404   :  { %2293 = vmatpush1.bf16.msra.mxu1 %v3422_v54  ;;  %v2895_v54 = vld [vmem:[%s4887_s4 + $0x130] sm:$0xff] }
 0x405   :  { %3167 = vmatprep.subr.bf16.mxu1 %v4925_v35 }
 0x407   :  { %2311 = vmatmul.mubr.bf16.vlgmr.msra.gmra.mxu1 %v3900_v26  ;;  %v2890_v26 = vld [vmem:[%s4887_s4 + $0x108] sm:$0xff] }
 0x408   :  { %3183 = vmatprep.mubr.msk.bf16.mxu1 %vm3477_vm3, %v4925_v35  ;;  %v2108_v8 = vmul.f32 %v4344_v46, %v2890_v26  ;;  %v2892_v46 = vld [vmem:[%s4887_s4 + $0x118] sm:$0xff]  ;;  %v2136_v26 = vmax.f32 %v2115_v44, %v2117_v20 }
 0x409   :  { %v2110_v59 = vmul.f32 %v4387_v18, %v2892_v46  ;;  %v2164_v18 = vadd.f32 %v2163_v42, %v2118_v23  ;;  %v1953_v42 = vrot.slane %v4197_v61, 4 }
 0x40a   :  { %v2149_v1 = vadd.f32 %v2108_v8, %v2107_v30 }
 0x40c   :  { %v2150_v34 = vadd.f32 %v2149_v1, %v2109_v43 }
 0x40e   :  { %v2151_v2 = vadd.f32 %v2150_v34, %v2110_v59 }
 0x4a7   :  { %v1918_v16 = vpop.f32.mrf.mxu1 }
 0x4a8   :  { %v1919_v21 = vadd.f32 %v2873_v49, %v1918_v16  ;;  %v2120_v49 = vmul.f32 %v4435_v56, %v2902_v58  ;;  %v2152_v16 = vadd.f32 %v2151_v2, %v2111_v62 }
 0x4a9   :  { %v3145_v22 = vpop.f32.mrf.mxu1 }
 0x4aa   :  { %v1924_v7 = vsub.f32 0.0, %v1919_v21  ;;  %v2165_v21 = vadd.f32 %v2164_v18, %v2119_v3  ;;  %v2113_v22 = vmul.f32 %v4441_v28, %v2895_v54  ;;  %v2153_v55 = vadd.f32 %v2152_v16, %v2112_v51  ;;  %v3395_v18 = vld [vmem:[%s4886_s14 + $0x170] ss:$8 sps:$4 sm:$0xff]   ;;  %v3409_v16 = vld [vmem:[%s4886_s14 + $0x154] ss:$8 sps:$4 sm:$0xff]  }
 0x4ab   :  { %v1921_v6 = vpop.f32.mrf.mxu1  ;;  %v2122_v28 = vmul.f32 %v4469_v40, %v2904_v19  ;;  %v2139_v36 = vmax.f32 %v2137_v33, %v2120_v49 }
 0x4ac   :  { %v1925_v48 = vmul.f32 1.442695, %v1924_v7  ;;  %v2121_v7 = vmul.f32 %v4447_v41, %v2903_v24  ;;  %v2123_v6 = vmax.f32 %v2107_v30, %v2109_v43  ;;  %v2166_v56 = vadd.f32 %v2165_v21, %v2120_v49  ;;  %v2884_v30 = vld [vmem:[%s4897_s19 + $0x1] ss:$0 sm:$0xff]  ;;  %v3403_v24 = vld [vmem:[%s4886_s14 + $0x164] ss:$8 sps:$4 sm:$0xff]  }
 0x4ad   :  { %v3146_v60 = vpop.f32.mrf.mxu1  ;;  %v2154_v43 = vadd.f32 %v2153_v55, %v2113_v22  ;;  %v2141_v47 = vmax.f32 %v2139_v36, %v2122_v28  ;;  %v3413_v55 = vld [vmem:[%s4886_s14 + $0x140] ss:$8 sps:$4 sm:$0xff]  }
 0x4ae   :  { %3450 = vpow2.f32 %v1925_v48  ;;  %v2124_v48 = vmax.f32 %v2108_v8, %v2110_v59  ;;  %v2896_v60 = vld [vmem:[%s4887_s4 + $0x138] sm:$0xff]  ;;  %v2125_v37 = vmax.f32 %v2123_v6, %v2111_v62  ;;  %v2138_v8 = vmax.f32 %v2136_v26, %v2119_v3 }
 0x4af   :  { %v2114_v25 = vmul.f32 %v4463_v38, %v2896_v60  ;;  %v2167_v1 = vadd.f32 %v2166_v56, %v2121_v7  ;;  %v3415_v60 = vld [vmem:[%s4886_s14 + $0x144] ss:$8 sps:$4 sm:$0xff]   ;;  %v3421_v56 = vld [vmem:[%s4886_s14 + $0x134] ss:$8 sps:$4 sm:$0xff]  }
 0x4b0   :  { %v2126_v41 = vmax.f32 %v2124_v48, %v2112_v51  ;;  %v2127_v44 = vmax.f32 %v2125_v37, %v2113_v22  ;;  %v2140_v20 = vmax.f32 %v2138_v8, %v2121_v7  ;;  %v3407_v48 = vld [vmem:[%s4886_s14 + $0x150] ss:$8 sps:$4 sm:$0xff]   ;;  %v3427_v8 = vld [vmem:[%s4886_s14 + $0x124] ss:$8 sps:$4 sm:$0xff]  }
 0x4b1   :  { %v2155_v59 = vadd.f32 %v2154_v43, %v2114_v25  ;;  %v2168_v38 = vadd.f32 %v2167_v1, %v2122_v28 }
 0x4b2   :  { %v2128_v63 = vmax.f32 %v2126_v41, %v2114_v25  ;;  %v2142_v39 = vmax.f32 %v2140_v20, %v2141_v47 }
 0x4b3   :  { %v2156_v0 = vrot.slane %v2155_v59, 4 }
 0x4b4   :  { %v2129_v34 = vmax.f32 %v2127_v44, %v2128_v63  ;;  %v2143_v51 = vrot.slane %v2142_v39, 4  ;;  %v3430_v44 = vld [vmem:[%s4886_s14 + $0x114] ss:$8 sps:$4 sm:$0xff]  }
 0x4b5   :  { %v2157_v49 = vadd.f32 %v2156_v0, %v2155_v59 }
 0x4b6   :  { %v2130_v58 = vrot.slane %v2129_v34, 4  ;;  %v2144_v22 = vmax.f32 %v2142_v39, %v2143_v51 }
 0x4b7   :  { %v2158_v7 = vrot.slane %v2157_v49, 2 }
 0x4b8   :  { %v2131_v21 = vmax.f32 %v2129_v34, %v2130_v58  ;;  %v2145_v19 = vrot.slane %v2144_v22, 2  ;;  %v3438_v58 = vld [vmem:[%s4890_s17 + $0x98] sm:$0xff]  }
 0x4b9   :  { %v2159_v26 = vadd.f32 %v2158_v7, %v2157_v49  ;;  %v2887_v7 = vld [vmem:[%s4899_s5 + $0x1] ss:$0 sm:$0xff] }
 0x4ba   :  { %v2146_v28 = vmax.f32 %v2144_v22, %v2145_v19  ;;  %v3441_v22 = vld [vmem:[%s4890_s17 + $0x80] sm:$0xff]  }
 0x4bb   :  { %v3451_v13 = vpop.eup %3450  ;;  %v2160_v37 = vrot.slane %v2159_v26, 1 }
 0x4bc   :  { %v1927_v57 = vadd.f32 1.0, %v3451_v13  ;;  %v2169_v13 = vrot.slane %v2168_v38, 4  ;;  %v2147_v43 = vrot.slane %v2146_v28, 1 }
 0x4bd   :  { %v2161_v1 = vadd.f32 %v2160_v37, %v2159_v26 }
 0x4be   :  { %3452 = vrcp.f32 %v1927_v57  ;;  %v4926_v57 = vsub.f32 %v4186_v5, %v4197_v61  ;;  %v2170_v5 = vadd.f32 %v2169_v13, %v2168_v38  ;;  %v3401_v61 = vld [vmem:[%s4886_s14 + $0x160] ss:$8 sps:$4 sm:$0xff]   ;;  %v2148_v20 = vmax.f32 %v2146_v28, %v2147_v43  ;;  %v3428_v38 = vld [vmem:[%s4886_s14 + $0x110] ss:$8 sps:$4 sm:$0xff]  }
 0x4bf   :  { %v2175_v47 = vmul.f32 0.015625, %v2161_v1  ;;  %v3474_v13 = vld [vmem:[%s4895_s1 + $0x38] sm:$0xff]  }
 0x4c0   :  { %v1956_v62 = vrot.slane %v4926_v57, 2  ;;  %v2171_v6 = vrot.slane %v2170_v5, 2 }
 0x4c2   :  { %v2172_v33 = vadd.f32 %v2171_v6, %v2170_v5 }
 0x4c4   :  { %v2173_v41 = vrot.slane %v2172_v33, 1 }
 0x4cb   :  { %v3453_v4 = vpop.eup %3452 }
 0x4cc   :  { %v1939_v46 = vmul.f32 %v3453_v4, %v2884_v30  ;;  %v2174_v4 = vadd.f32 %v2173_v41, %v2172_v33 }
 0x4ce   :  { %v1940_v23 = vsub.f32 %v2884_v30, %v1939_v46  ;;  %v3419_v30 = vld [vmem:[%s4886_s14 + $0x130] ss:$8 sps:$4 sm:$0xff]   ;;  %v2176_v59 = vmul.f32 0.015625, %v2174_v4 }
 0x4d0   :  { %v1950_v40 = vrot.slane %v1940_v23, 6  ;;  %v3433_v23 = vld [vmem:[%s4886_s14 + $0x104] ss:$8 sps:$4 sm:$0xff]   ;;  %v2183_v34 = vsel %vm162_vm0, %v2176_v59, %v2175_v47 }
 0x4d2   :  { %v1958_v3 = vsel %vm165_vm2, %v1939_v46, %v1950_v40  ;;  %v3425_v46 = vld [vmem:[%s4886_s14 + $0x120] ss:$8 sps:$4 sm:$0xff]  }
 0x4d3   :  { %v1959_v2 = vsel %vm1262_vm12, %v1958_v3, %v1953_v42  ;;  %v3431_v42 = vld [vmem:[%s4886_s14 + $0x100] ss:$8 sps:$4 sm:$0xff]  }
 0x4d4   :  { %v1960_v17 = vsel %vm1264_vm13, %v1959_v2, %v1956_v62  ;;  %v3437_v62 = vld [vmem:[%s4890_s17 + $0xa0] sm:$0xff]  }
 0x4d5   :  { %v1961_v54 = vpack.c.bf16 %v1960_v17, %v1960_v17 }
 0x4d7   :  { %3164 = vmatmul.mubr.bf16.vlgmr.msra.gmra.mxu0 %v1961_v54 }
 0x4d8   :  { %2417 = vmatpush1.bf16.msra.mxu0 %v3395_v18  ;;  %2448 = vmatprep.mubr.bf16.mxu0 %v4924_v31  ;;  %v2132_v31 = vrot.slane %v2131_v21, 2 }
 0x4d9   :  { %2418 = vmatprep.subr.bf16.mxu0 %v3403_v24 }
 0x4da   :  { %v2133_v25 = vmax.f32 %v2131_v21, %v2132_v31  ;;  %v3440_v21 = vld [vmem:[%s4890_s17 + $0x88] sm:$0xff]  }
 0x4dc   :  { %2419 = vmatpush1.bf16.msra.mxu0 %v3401_v61  ;;  %v2134_v36 = vrot.slane %v2133_v25, 1 }
 0x4dd   :  { %2420 = vmatprep.subr.bf16.mxu0 %v3409_v16  ;;  %v3439_v16 = vld [vmem:[%s4890_s17 + $0x90] sm:$0xff]  }
 0x4de   :  { %v2135_v63 = vmax.f32 %v2133_v25, %v2134_v36 }
 0x4e0   :  { %2421 = vmatpush1.bf16.msra.mxu0 %v3407_v48  ;;  %v2179_v40 = vsel %vm157_vm1, %v2148_v20, %v2135_v63 }
 0x4e1   :  { %2422 = vmatprep.subr.bf16.mxu0 %v3415_v60  ;;  %v2185_v39 = vsel %vm165_vm2, %v2179_v40, %v2183_v34 }
 0x4e2   :  { %v2186_v0 = vpack.c.bf16 %v2185_v39, %v2185_v39 }
 0x4e4   :  { %2423 = vmatpush1.bf16.msra.mxu0 %v3413_v55 }
 0x4e5   :  { %2424 = vmatprep.subr.bf16.mxu0 %v3421_v56 }
 0x4e8   :  { %2425 = vmatpush1.bf16.msra.mxu0 %v3419_v30 }
 0x4e9   :  { %2426 = vmatprep.subr.bf16.mxu0 %v3427_v8 }
 0x4ec   :  { %2427 = vmatpush1.bf16.msra.mxu0 %v3425_v46  ;;  %v2938_v46 = vld [vmem:[%s4893_s16 + $0x4] sm:$0x3] }
 0x4ed   :  { %2428 = vmatprep.subr.bf16.mxu0 %v3430_v44  ;;  %v2329_v44 = vrot.slane %v2938_v46, %v4043_v15  ;;  %v2333_v63 = vrot.slane %v2938_v46, %v4023_v27 }
 0x4f0   :  { %2429 = vmatpush1.bf16.msra.mxu0 %v3428_v38 }
 0x4f1   :  { %2430 = vmatprep.subr.bf16.mxu0 %v3433_v23 }
 0x4f4   :  { %2431 = vmatpush1.bf16.msra.mxu0 %v3431_v42 }
 0x4f5   :  { %3187 = vmatprep.subr.bf16.mxu0 %v4925_v35 }
 0x4f7   :  { %2449 = vmatmul.mubr.bf16.vlgmr.msra.gmra.mxu0 %v2186_v0 }
 0x4f8   :  { %3188 = vmatpush3.bf16.msra.mxu0 %v3474_v13  ;;  %3203 = vmatprep.mubr.msk.bf16.mxu0 %vm3477_vm3, %v4925_v35 }
 0x4f9   :  { %3189 = vmatprep.subr.bf16.mxu0 %v4925_v35 }
 0x4fc   :  { %3190 = vmatpush3.bf16.msra.mxu0 %v4218_v9  ;;  %v3434_v9 = vld [vmem:[%s4890_s17 + $0xb8] sm:$0xff]  }
 0x4fd   :  { %3191 = vmatprep.subr.bf16.mxu0 %v4925_v35  ;;  %3168 = vmatpush3.bf16.msra.mxu1 %v3434_v9 }
 0x4fe   :  { %3169 = vmatprep.subr.bf16.mxu1 %v4925_v35 }
 0x500   :  { %3192 = vmatpush3.bf16.msra.mxu0 %v4225_v11  ;;  %v3435_v11 = vld [vmem:[%s4890_s17 + $0xb0] sm:$0xff]  }
 0x501   :  { %3193 = vmatprep.subr.bf16.mxu0 %v4925_v35  ;;  %3170 = vmatpush3.bf16.msra.mxu1 %v3435_v11 }
 0x502   :  { %3171 = vmatprep.subr.bf16.mxu1 %v4925_v35 }
 0x504   :  { %3194 = vmatpush3.bf16.msra.mxu0 %v4240_v14  ;;  %v3436_v14 = vld [vmem:[%s4890_s17 + $0xa8] sm:$0xff]  }
 0x505   :  { %3195 = vmatprep.subr.bf16.mxu0 %v4925_v35  ;;  %3172 = vmatpush3.bf16.msra.mxu1 %v3436_v14 }
 0x506   :  { %3173 = vmatprep.subr.bf16.mxu1 %v4925_v35 }
 0x508   :  { %3196 = vmatpush3.bf16.msra.mxu0 %v4253_v10  ;;  %v2937_v10 = vld [vmem:[%s4891_s15 + $0x4] sm:$0x3] }
 0x509   :  { %3197 = vmatprep.subr.bf16.mxu0 %v4925_v35  ;;  %3174 = vmatpush3.bf16.msra.mxu1 %v3437_v62 }
 0x50a   :  { %3175 = vmatprep.subr.bf16.mxu1 %v4925_v35 }
 0x50c   :  { %3198 = vmatpush3.bf16.msra.mxu0 %v4263_v52  ;;  %v2312_v52 = vpop.f32.mrf.mxu1 }
 0x50d   :  { %3199 = vmatprep.subr.bf16.mxu0 %v4925_v35  ;;  %3176 = vmatpush3.bf16.msra.mxu1 %v3438_v58 }
 0x50e   :  { %v2314_v57 = vpop.f32.mrf.mxu1  ;;  %3177 = vmatprep.subr.bf16.mxu1 %v4925_v35 }
 0x510   :  { %3200 = vmatpush3.bf16.msra.mxu0 %v4270_v32  ;;  %v2195_v32 = vrot.slane %v2937_v10, %v4023_v27  ;;  %v2316_v18 = vpop.f32.mrf.mxu1  ;;  %v2988_v27 = vld [vmem:[%s4896_s18 + $0x2] ss:$0 sm:$0xff] }
 0x511   :  { %3201 = vmatprep.subr.bf16.mxu0 %v4925_v35  ;;  %3178 = vmatpush3.bf16.msra.mxu1 %v3439_v16  ;;  %v2999_v18 = vld [vmem:[%s4897_s19 + $0x2] ss:$0 sm:$0xff] }
 0x512   :  { %v2315_v3 = vadd.f32 %v2314_v57, %v2195_v32  ;;  %v2317_v24 = vpop.f32.mrf.mxu1  ;;  %3179 = vmatprep.subr.bf16.mxu1 %v4925_v35 }
 0x514   :  { %3202 = vmatpush3.bf16.msra.mxu0 %v4277_v45  ;;  %v2191_v45 = vrot.slane %v2937_v10, %v4043_v15  ;;  %vm2320_vm0 = vcmp.ge.f32.partialorder %v2315_v3, 0.0  ;;  %v2322_v17 = vmul.f32 0.2, %v2315_v3 }
 0x515   :  { %3180 = vmatpush3.bf16.msra.mxu1 %v3440_v21 }
 0x516   :  { %v2313_v2 = vadd.f32 %v2312_v52, %v2191_v45  ;;  %v2324_v51 = vsel %vm2320_vm0, %v2315_v3, %v2322_v17  ;;  %3181 = vmatprep.subr.bf16.mxu1 %v4925_v35 }
 0x517   :  { %v2464_v5 = vrot.slane %v2324_v51, 2  ;;  %v2596_v51 = vrot.slane %v4201_v12, 4 }
 0x518   :  { %vm2319_vm1 = vcmp.ge.f32.partialorder %v2313_v2, 0.0  ;;  %v2321_v54 = vmul.f32 0.2, %v2313_v2 }
 0x519   :  { %3182 = vmatpush3.bf16.msra.mxu1 %v3441_v22 }
 0x51a   :  { %v2323_v49 = vsel %vm2319_vm1, %v2313_v2, %v2321_v54 }
 0x51b   :  { %v2466_v61 = vadd.f32 %v2464_v5, %v2323_v49  ;;  %v4927_v49 = vsub.f32 %v4191_v53, %v4201_v12 }
 0x51d   :  { %v2599_v5 = vrot.slane %v4927_v49, 2 }
 0x597   :  { %v1996_v6 = vpop.f32.mrf.mxu0 }
 0x598   :  { %v2010_v48 = vmul.f32 %v2887_v7, %v1996_v6  ;;  %v2012_v60 = vrot.slane %v1996_v6, 2  ;;  %v2015_v31 = vmul.f32 %v4585_v50, %v1996_v6  ;;  %v2020_v35 = vrot.slane %v1996_v6, 6  ;;  %v3002_v7 = vld [vmem:[%s4899_s5 + $0x2] ss:$0 sm:$0xff] }
 0x599   :  { %v3165_v19 = vpop.f32.mrf.mxu0 }
 0x59a   :  { %v2014_v26 = vadd.f32 %v2012_v60, %v2010_v48  ;;  %v2017_v33 = vrot.slane %v2015_v31, 4 }
 0x59b   :  { %v1999_v55 = vpop.f32.mrf.mxu0 }
 0x59c   :  { %v2019_v56 = vadd.f32 %v2017_v33, %v2014_v26 }
 0x59d   :  { %v3166_v25 = vpop.f32.mrf.mxu0 }
 0x59e   :  { %v2022_v28 = vadd.f32 %v2020_v35, %v2019_v56 }
 0x5a0   :  { %v2023_v37 = vmul.f32 %v2022_v28, %v4594_v29 }
 0x5a2   :  { %v2024_v41 = vsel %vm165_vm2, %v2023_v37, 0.0 }
 0x5a3   :  { %v2025_v30 = vrot.slane %v2024_v41, 4 }
 0x5a5   :  { %v2026_v8 = vadd.f32 %v2025_v30, %v2024_v41 }
 0x5a7   :  { %v2027_v36 = vrot.slane %v2026_v8, 2 }
 0x5a9   :  { %v2028_v43 = vadd.f32 %v2027_v36, %v2026_v8 }
 0x5ab   :  { %v2029_v1 = vrot.slane %v2028_v43, 1 }
 0x5ad   :  { %v2030_v4 = vadd.f32 %v2029_v1, %v2028_v43 }
 0x5af   :  { %2888 = vst [vmem:[%s4901_s21 + $0x1] sm:$0x1] %v2030_v4 }
 0x5b7   :  { %v2450_v20 = vpop.f32.mrf.mxu0 }
 0x5b8   :  { %v2451_v47 = vadd.f32 %v2450_v20, %v2329_v44 }
 0x5b9   :  { %v2452_v59 = vpop.f32.mrf.mxu0 }
 0x5ba   :  { %vm2457_vm3 = vcmp.ge.f32.partialorder %v2451_v47, 0.0  ;;  %v2459_v38 = vmul.f32 0.2, %v2451_v47  ;;  %v2453_v23 = vadd.f32 %v2452_v59, %v2333_v63 }
 0x5bb   :  { %v2454_v40 = vpop.f32.mrf.mxu0 }
 0x5bc   :  { %v2461_v34 = vsel %vm2457_vm3, %v2451_v47, %v2459_v38  ;;  %vm2458_vm6 = vcmp.ge.f32.partialorder %v2453_v23, 0.0  ;;  %v2460_v42 = vmul.f32 0.2, %v2453_v23 }
 0x5bd   :  { %v2455_v39 = vpop.f32.mrf.mxu0  ;;  %v2467_v13 = vadd.f32 %v2466_v61, %v2461_v34 }
 0x5be   :  { %v2462_v0 = vsel %vm2458_vm6, %v2453_v23, %v2460_v42 }
 0x5bf   :  { %v2469_v9 = vrot.slane %v2462_v0, 2 }
 0x5c1   :  { %v2471_v11 = vadd.f32 %v2469_v9, %v2467_v13 }
 0x5c3   :  { %v2472_v14 = vpack.c.bf16 %v2471_v11, %v2471_v11 }
 0x5c5   :  { %3184 = vmatmul.mubr.bf16.vlgmr.msra.gmra.mxu1 %v2472_v14 }
 0x685   :  { %v2561_v15 = vpop.f32.mrf.mxu1 }
 0x686   :  { %v2562_v10 = vadd.f32 %v2988_v27, %v2561_v15 }
 0x687   :  { %v3185_v52 = vpop.f32.mrf.mxu1 }
 0x688   :  { %v2567_v32 = vsub.f32 0.0, %v2562_v10 }
 0x689   :  { %v2564_v45 = vpop.f32.mrf.mxu1 }
 0x68a   :  { %v2568_v57 = vmul.f32 1.442695, %v2567_v32 }
 0x68b   :  { %v3186_v62 = vpop.f32.mrf.mxu1 }
 0x68c   :  { %3454 = vpow2.f32 %v2568_v57 }
 0x699   :  { %v3455_v3 = vpop.eup %3454 }
 0x69a   :  { %v2570_v2 = vadd.f32 1.0, %v3455_v3 }
 0x69c   :  { %3456 = vrcp.f32 %v2570_v2 }
 0x6a9   :  { %v3457_v17 = vpop.eup %3456 }
 0x6aa   :  { %v2582_v58 = vmul.f32 %v3457_v17, %v2999_v18 }
 0x6ac   :  { %v2583_v54 = vsub.f32 %v2999_v18, %v2582_v58 }
 0x6ae   :  { %v2593_v24 = vrot.slane %v2583_v54, 6 }
 0x6b0   :  { %v2601_v61 = vsel %vm165_vm2, %v2582_v58, %v2593_v24 }
 0x6b1   :  { %v2602_v16 = vsel %vm1262_vm12, %v2601_v61, %v2596_v51 }
 0x6b2   :  { %v2603_v21 = vsel %vm1264_vm13, %v2602_v16, %v2599_v5 }
 0x6b3   :  { %v2604_v22 = vpack.c.bf16 %v2603_v21, %v2603_v21 }
 0x6b5   :  { %3204 = vmatmul.mubr.bf16.vlgmr.msra.gmra.mxu0 %v2604_v22 }
 0x775   :  { %v2639_v6 = vpop.f32.mrf.mxu0 }
 0x776   :  { %v2653_v48 = vmul.f32 %v3002_v7, %v2639_v6  ;;  %v2655_v60 = vrot.slane %v2639_v6, 2  ;;  %v2658_v31 = vmul.f32 %v4585_v50, %v2639_v6  ;;  %v2663_v55 = vrot.slane %v2639_v6, 6 }
 0x777   :  { %v3205_v19 = vpop.f32.mrf.mxu0 }
 0x778   :  { %v2657_v53 = vadd.f32 %v2655_v60, %v2653_v48  ;;  %v2660_v12 = vrot.slane %v2658_v31, 4 }
 0x779   :  { %v2642_v26 = vpop.f32.mrf.mxu0 }
 0x77a   :  { %v2662_v33 = vadd.f32 %v2660_v12, %v2657_v53 }
 0x77b   :  { %v3206_v56 = vpop.f32.mrf.mxu0 }
 0x77c   :  { %v2665_v35 = vadd.f32 %v2663_v55, %v2662_v33 }
 0x77e   :  { %v2666_v25 = vmul.f32 %v2665_v35, %v4594_v29 }
 0x780   :  { %v2667_v28 = vsel %vm165_vm2, %v2666_v25, 0.0 }
 0x781   :  { %v2668_v37 = vrot.slane %v2667_v28, 4 }
 0x783   :  { %v2669_v41 = vadd.f32 %v2668_v37, %v2667_v28 }
 0x785   :  { %v2670_v30 = vrot.slane %v2669_v41, 2 }
 0x787   :  { %v2671_v8 = vadd.f32 %v2670_v30, %v2669_v41 }
 0x789   :  { %v2672_v36 = vrot.slane %v2671_v8, 1 }
 0x78b   :  { %v2673_v43 = vadd.f32 %v2672_v36, %v2671_v8 }
 0x78d   :  { %3003 = vst [vmem:[%s4901_s21 + $0x2] sm:$0x1] %v2673_v43 }

</bundles_post_ra>
